<compile_context>
chip_gen: v7x
topology: tpu7x:2x2x1
jax: 0.10.0
libtpu: 0.0.40
codegen_flags: <defaults>
</compile_context>

<pallas_src>
import math

import jax
import jax.numpy as jnp
import numpy as np
from jax.experimental import pallas as pl
from jax.experimental.pallas import tpu as pltpu


def _round_up(x, m):
    return (x + m - 1) // m * m


# ----------------------- Pallas kernel (all FFT blocks fused) -----------------------

def make_decoder_kernel(*, n_layers, batch_block, seq_len, d_real, d_pad,
                        n_head, d_k, d_v, hk_pad, k1, p1, k2, p2, compute_dtype):
    rows = batch_block * seq_len
    inv_d = 1.0 / float(d_real)

    def mm(a, w):  # MXU matmul, f32 accumulation; operands in compute_dtype
        return jnp.dot(a.astype(compute_dtype), w,
                       preferred_element_type=jnp.float32)

    def layernorm(h, g, b, cmask):
        # LayerNorm over the REAL d_model columns (padded lanes are zero everywhere,
        # gamma/beta padded with zeros so padded output lanes stay zero).
        mu = jnp.sum(h, axis=-1, keepdims=True) * inv_d
        c = (h - mu) * cmask
        var = jnp.sum(c * c, axis=-1, keepdims=True) * inv_d
        return c * jax.lax.rsqrt(var + 1e-5) * g + b

    def shifted(h, off, tt):
        # Rows shifted by `off` *within each sequence*; out-of-range rows -> 0.
        # TODO(synk): pltpu.roll(h, shift, axis=0) would do this shift on the XLU
        # slot without the sublane copy; slice+concat kept for lowering robustness.
        if off == 0:
            return h
        z = jnp.zeros((abs(off), h.shape[1]), h.dtype)
        if off > 0:
            sh = jnp.concatenate([h[off:, :], z], axis=0)
        else:
            sh = jnp.concatenate([z, h[:off, :]], axis=0)
        valid = jnp.logical_and(tt + off >= 0, tt + off < seq_len)
        return jnp.where(valid, sh, 0.0)

    def conv1d(h, w_ref, b_ref, ksize, padw, tt):
        # im2col: build (rows, ksize*C) once and do ONE MXU matmul against the
        # tap-major (ksize*C, Cout) weight prepared in the wrapper.
        if ksize == 1:
            cols = h
        else:
            cols = jnp.concatenate(
                [shifted(h, i - padw, tt) for i in range(ksize)], axis=-1)
        return mm(cols, w_ref[0]) + b_ref[0]

    def kernel(x_ref, npad_ref, tt_ref, bias_ref,
               wqkv_ref, bqkv_ref, wfc_ref, bfc_ref, g1_ref, b1_ref,
               w1_ref, cb1_ref, w2_ref, cb2_ref, g2_ref, b2_ref,
               out_ref, xcur_ref):
        layer = pl.program_id(1)

        @pl.when(layer == 0)
        def _():  # load the activation carry once per batch block
            xcur_ref[...] = x_ref[...]

        x = xcur_ref[...]                               # (rows, Dp) f32
        npad = npad_ref[...]                            # (rows, 1)  non-pad mask
        tt = tt_ref[...]                                # (rows, 1)  pos within sequence
        cmask = (jax.lax.broadcasted_iota(jnp.int32, (1, d_pad), 1) < d_real
                 ).astype(jnp.float32)

        # ---- multi-head self-attention -------------------------------------
        # Fused Q|K|V projection: ONE lane-dense MXU matmul.  Q is pre-scaled by
        # 1/sqrt(d_k) in the wrapper (folded into wq / bq).
        qkv = mm(x, wqkv_ref[0]) + bqkv_ref[0]          # (rows, 2*HKp + HVp)

        ctx_rows = []
        for s in range(batch_block):                    # scores must stay per-sequence
            bias = bias_ref[s]                          # (1, T) additive key-pad bias
            r0 = s * seq_len
            ctx_heads = []
            for h in range(n_head):
                q = qkv[r0:r0 + seq_len, h * d_k:(h + 1) * d_k]
                k = qkv[r0:r0 + seq_len, hk_pad + h * d_k:hk_pad + (h + 1) * d_k]
                v = qkv[r0:r0 + seq_len,
                        2 * hk_pad + h * d_v:2 * hk_pad + (h + 1) * d_v]
                sc = jax.lax.dot_general(
                    q.astype(compute_dtype), k.astype(compute_dtype),
                    (((1,), (1,)), ((), ())),
                    preferred_element_type=jnp.float32) + bias       # (T, T)
                m = jnp.max(sc, axis=-1, keepdims=True)
                p = jnp.exp(sc - m)
                denom = jnp.sum(p, axis=-1, keepdims=True)
                ctx = jnp.dot(p.astype(compute_dtype), v.astype(compute_dtype),
                              preferred_element_type=jnp.float32)    # (T, dv)
                ctx_heads.append(ctx / denom)          # deferred softmax normalization
            ctx_rows.append(jnp.concatenate(ctx_heads, axis=-1))
        ctx_all = (ctx_rows[0] if batch_block == 1
                   else jnp.concatenate(ctx_rows, axis=0))           # (rows, H*dv)

        attn = mm(ctx_all, wfc_ref[0]) + bfc_ref[0]     # heads folded into ONE matmul
        h1 = layernorm(attn + x, g1_ref[0], b1_ref[0], cmask) * npad

        # ---- position-wise FFN: Conv1d(k1) -> ReLU -> Conv1d(k2) ------------
        c = conv1d(h1, w1_ref, cb1_ref, k1, p1, tt)
        c = jnp.maximum(c, 0.0)
        c = conv1d(c, w2_ref, cb2_ref, k2, p2, tt)
        h2 = layernorm(c + h1, g2_ref[0], b2_ref[0], cmask) * npad

        xcur_ref[...] = h2                              # carry to the next layer

        @pl.when(layer == n_layers - 1)
        def _():
            out_ref[...] = h2

    return kernel


# ------------------------------ parameter preparation ------------------------------

def prepare_kernel_params(params, cfg, compute_dtype):
    """Pack / pad / stack torch-layout params into the kernel layout (all free)."""
    D, F = cfg["d_model"], cfg["d_inner"]
    H, dk, dv = cfg["n_head"], cfg["d_k"], cfg["d_v"]
    k1, k2 = cfg["fft_conv1d_kernel"]
    Dp, Fp = _round_up(D, 128), _round_up(F, 128)
    HK, HV = H * dk, H * dv
    HKp, HVp = _round_up(HK, 128), _round_up(HV, 128)
    Wq = 2 * HKp + HVp
    inv_temp = 1.0 / float(np.sqrt(dk))

    def padded(a, shape):
        return jnp.pad(a, [(0, t - s) for s, t in zip(a.shape, shape)])

    names = ["wqkv", "bqkv", "wfc", "bfc", "g1", "b1",
             "w1", "cb1", "w2", "cb2", "g2", "b2"]
    acc = {n: [] for n in names}
    for lp in params["layers"]:
        wqkv = jnp.zeros((Dp, Wq), jnp.float32)
        wqkv = wqkv.at[:D, :HK].set(lp["w_qs"] * inv_temp)           # pre-scaled Q
        wqkv = wqkv.at[:D, HKp:HKp + HK].set(lp["w_ks"])
        wqkv = wqkv.at[:D, 2 * HKp:2 * HKp + HV].set(lp["w_vs"])
        bqkv = jnp.zeros((1, Wq), jnp.float32)
        bqkv = bqkv.at[0, :HK].set(lp["b_qs"] * inv_temp)
        bqkv = bqkv.at[0, HKp:HKp + HK].set(lp["b_ks"])
        bqkv = bqkv.at[0, 2 * HKp:2 * HKp + HV].set(lp["b_vs"])
        w1 = jnp.zeros((k1 * Dp, Fp), jnp.float32)                   # im2col, tap-major
        for i in range(k1):
            w1 = w1.at[i * Dp:i * Dp + D, :F].set(lp["conv1_w"][i])
        w2 = jnp.zeros((k2 * Fp, Dp), jnp.float32)
        for i in range(k2):
            w2 = w2.at[i * Fp:i * Fp + F, :D].set(lp["conv2_w"][i])

        acc["wqkv"].append(wqkv)
        acc["bqkv"].append(bqkv)
        acc["wfc"].append(padded(lp["w_fc"], (HV, Dp)))
        acc["bfc"].append(padded(lp["b_fc"][None, :], (1, Dp)))
        acc["g1"].append(padded(lp["ln1_g"][None, :], (1, Dp)))
        acc["b1"].append(padded(lp["ln1_b"][None, :], (1, Dp)))
        acc["w1"].append(w1)
        acc["cb1"].append(padded(lp["conv1_b"][None, :], (1, Fp)))
        acc["w2"].append(w2)
        acc["cb2"].append(padded(lp["conv2_b"][None, :], (1, Dp)))
        acc["g2"].append(padded(lp["ln2_g"][None, :], (1, Dp)))
        acc["b2"].append(padded(lp["ln2_b"][None, :], (1, Dp)))

    stacked = {n: jnp.stack(v, axis=0) for n, v in acc.items()}      # leading L axis
    for n in ("wqkv", "wfc", "w1", "w2"):             # MXU operands -> compute dtype
        stacked[n] = stacked[n].astype(compute_dtype)
    meta = dict(Dp=Dp, Fp=Fp, HKp=HKp, Wq=Wq)
    return stacked, meta


# ---------------------------------- forward wrapper ----------------------------------

def decoder_forward(enc_seq, enc_pos, params, cfg, compute_dtype=jnp.float32):
    """Decoder.forward: enc_seq (B,T,D) f32, enc_pos (B,T) int32 -> (B,T,D) f32."""
    pad = cfg["pad"]
    D, L = cfg["d_model"], cfg["n_layers"]
    H, dk, dv = cfg["n_head"], cfg["d_k"], cfg["d_v"]
    k1, k2 = cfg["fft_conv1d_kernel"]
    p1, p2 = cfg["fft_conv1d_padding"]
    B, T, _ = enc_seq.shape

    kp, meta = prepare_kernel_params(params, cfg, compute_dtype)
    Dp, Fp, HKp, Wq = meta["Dp"], meta["Fp"], meta["HKp"], meta["Wq"]

    # batch rows per grid step: fill the MXU M dimension (target >= 128 rows)
    target = max(1, math.ceil(128 / T))
    Bb = max(d for d in range(1, B + 1) if B % d == 0 and d <= target)
    rows = Bb * T

    # masks + positional-embedding gather (data-dependent) in plain JAX
    # TODO(synk): the nn.Embedding gather could move in-kernel via scalar prefetch
    # + pl.Element-indexed DMA; kept as jnp.take in the wrapper.
    pos_emb = jnp.take(params["pos_table"], enc_pos, axis=0)
    x = (enc_seq + pos_emb).astype(jnp.float32)
    x = jnp.pad(x, ((0, 0), (0, 0), (0, Dp - D)))            # lane-dense last dim
    x_flat = x.reshape(B * T, Dp)
    non_pad = (enc_pos != pad).astype(jnp.float32).reshape(B * T, 1)
    # finite large-negative bias: exp underflows to exactly 0 for masked keys while
    # fully-padded rows stay finite (review correctness concern)
    attn_bias = jnp.where(enc_pos == pad, -1e9, 0.0).astype(jnp.float32)[:, None, :]
    tt = jnp.asarray(np.tile(np.arange(T, dtype=np.int32), Bb)).reshape(rows, 1)

    kernel = make_decoder_kernel(
        n_layers=L, batch_block=Bb, seq_len=T, d_real=D, d_pad=Dp,
        n_head=H, d_k=dk, d_v=dv, hk_pad=HKp,
        k1=k1, p1=p1, k2=k2, p2=p2, compute_dtype=compute_dtype)

    row_map = lambda b, l: (b, 0)         # flattened activations, resident over layers
    const2 = lambda b, l: (0, 0)          # per-block constants
    seq_map = lambda b, l: (b, 0, 0)      # per-sequence attention bias
    layer_map = lambda b, l: (l, 0, 0)    # stacked per-layer weights (pipelined over l)

    out = pl.pallas_call(
        kernel,
        out_shape=jax.ShapeDtypeStruct((B * T, Dp), jnp.float32),
        grid_spec=pltpu.PrefetchScalarGridSpec(
            num_scalar_prefetch=0,
            grid=(B // Bb, L),                           # layer axis innermost
            in_specs=[
                pl.BlockSpec((rows, Dp), row_map),       # x (flattened rows)
                pl.BlockSpec((rows, 1), row_map),        # non-pad mask
                pl.BlockSpec((rows, 1), const2),         # within-sequence position
                pl.BlockSpec((Bb, 1, T), seq_map),       # additive key-pad bias
                pl.BlockSpec((1, Dp, Wq), layer_map),    # fused Q|K|V weight
                pl.BlockSpec((1, 1, Wq), layer_map),     # fused Q|K|V bias
                pl.BlockSpec((1, H * dv, Dp), layer_map),  # attention output proj
                pl.BlockSpec((1, 1, Dp), layer_map),     # fc bias
                pl.BlockSpec((1, 1, Dp), layer_map),     # ln1 gamma
                pl.BlockSpec((1, 1, Dp), layer_map),     # ln1 beta
                pl.BlockSpec((1, k1 * Dp, Fp), layer_map),  # conv1 weight (im2col)
                pl.BlockSpec((1, 1, Fp), layer_map),     # conv1 bias
                pl.BlockSpec((1, k2 * Fp, Dp), layer_map),  # conv2 weight (im2col)
                pl.BlockSpec((1, 1, Dp), layer_map),     # conv2 bias
                pl.BlockSpec((1, 1, Dp), layer_map),     # ln2 gamma
                pl.BlockSpec((1, 1, Dp), layer_map),     # ln2 beta
            ],
            out_specs=pl.BlockSpec((rows, Dp), row_map),
            scratch_shapes=[pltpu.VMEM((rows, Dp), jnp.float32)],    # layer carry
        ),
        compiler_params=pltpu.CompilerParams(
            dimension_semantics=("parallel", "arbitrary")),
    )(x_flat, non_pad, tt, attn_bias,
      kp["wqkv"], kp["bqkv"], kp["wfc"], kp["bfc"], kp["g1"], kp["b1"],
      kp["w1"], kp["cb1"], kp["w2"], kp["cb2"], kp["g2"], kp["b2"])

    return out.reshape(B, T, Dp)[:, :, :D]


# ------------------------------- pure-JAX reference -------------------------------

def decoder_reference(enc_seq, enc_pos, params, cfg):
    pad = cfg["pad"]
    H, dk, dv = cfg["n_head"], cfg["d_k"], cfg["d_v"]
    k1, k2 = cfg["fft_conv1d_kernel"]
    p1, p2 = cfg["fft_conv1d_padding"]
    temp = float(np.sqrt(dk))

    x = enc_seq + params["pos_table"][enc_pos]
    non_pad = (enc_pos != pad).astype(jnp.float32)[..., None]
    key_pad = (enc_pos == pad)

    def ln(h, g, b):
        mu = jnp.mean(h, -1, keepdims=True)
        var = jnp.mean(jnp.square(h - mu), -1, keepdims=True)
        return (h - mu) * jax.lax.rsqrt(var + 1e-5) * g + b

    def conv(h, w, b, ksize, padw):
        B_, T_, _ = h.shape
        hp = jnp.pad(h, ((0, 0), (padw, padw), (0, 0)))
        return sum(jnp.einsum("btc,cf->btf", hp[:, i:i + T_, :], w[i])
                   for i in range(ksize)) + b

    for lp in params["layers"]:
        B_, T_, _ = x.shape
        q = (x @ lp["w_qs"] + lp["b_qs"]).reshape(B_, T_, H, dk)
        k = (x @ lp["w_ks"] + lp["b_ks"]).reshape(B_, T_, H, dk)
        v = (x @ lp["w_vs"] + lp["b_vs"]).reshape(B_, T_, H, dv)
        s = jnp.einsum("bqhd,bkhd->bhqk", q, k) / temp
        s = jnp.where(key_pad[:, None, None, :], -jnp.inf, s)
        a = jax.nn.softmax(s, axis=-1)
        ctx = jnp.einsum("bhqk,bkhd->bqhd", a, v).reshape(B_, T_, H * dv)
        attn_out = ctx @ lp["w_fc"] + lp["b_fc"]
        h1 = ln(attn_out + x, lp["ln1_g"], lp["ln1_b"]) * non_pad
        c = jnp.maximum(conv(h1, lp["conv1_w"], lp["conv1_b"], k1, p1), 0.0)
        c = conv(c, lp["conv2_w"], lp["conv2_b"], k2, p2)
        x = ln(c + h1, lp["ln2_g"], lp["ln2_b"]) * non_pad
    return x


# ------------------------------------ parameters ------------------------------------

def init_decoder_params(key, cfg):
    D, F = cfg["d_model"], cfg["d_inner"]
    H, dk, dv = cfg["n_head"], cfg["d_k"], cfg["d_v"]
    k1, k2 = cfg["fft_conv1d_kernel"]
    n_pos = cfg["max_seq_len"] + 1
    s = 0.1

    keys = jax.random.split(key, cfg["n_layers"] + 1)
    pos_table = s * jax.random.normal(keys[0], (n_pos, D), jnp.float32)
    pos_table = pos_table.at[cfg["pad"]].set(0.0)          # padding_idx row is zero

    layers = []
    for li in range(cfg["n_layers"]):
        ks = jax.random.split(keys[li + 1], 12)
        layers.append(dict(
            w_qs=s * jax.random.normal(ks[0], (D, H * dk), jnp.float32),
            b_qs=s * jax.random.normal(ks[1], (H * dk,), jnp.float32),
            w_ks=s * jax.random.normal(ks[2], (D, H * dk), jnp.float32),
            b_ks=s * jax.random.normal(ks[3], (H * dk,), jnp.float32),
            w_vs=s * jax.random.normal(ks[4], (D, H * dv), jnp.float32),
            b_vs=s * jax.random.normal(ks[5], (H * dv,), jnp.float32),
            w_fc=s * jax.random.normal(ks[6], (H * dv, D), jnp.float32),
            b_fc=s * jax.random.normal(ks[7], (D,), jnp.float32),
            ln1_g=jnp.ones((D,), jnp.float32),
            ln1_b=jnp.zeros((D,), jnp.float32),
            conv1_w=s * jax.random.normal(ks[8], (k1, D, F), jnp.float32),
            conv1_b=s * jax.random.normal(ks[9], (F,), jnp.float32),
            conv2_w=s * jax.random.normal(ks[10], (k2, F, D), jnp.float32),
            conv2_b=s * jax.random.normal(ks[11], (D,), jnp.float32),
            ln2_g=jnp.ones((D,), jnp.float32),
            ln2_b=jnp.zeros((D,), jnp.float32),
        ))
    return {"pos_table": pos_table, "layers": layers}


if __name__ == "__main__":
    # Decoder(decoder_dim=32, decoder_conv1d_filter_size=64, decoder_head=2,
    #         max_seq_len=32, n_layers=2, pad=0, dropout=0.1,
    #         fft_conv1d_kernel=(3,1), fft_conv1d_padding=(1,0)); batch=2, seq=16.
    cfg = dict(d_model=32, d_inner=64, n_head=2, d_k=16, d_v=16,
               n_layers=2, pad=0, max_seq_len=32,
               fft_conv1d_kernel=(3, 1), fft_conv1d_padding=(1, 0))
    B, T = 2, 16
    # residual add inside PositionwiseFeedForward requires length-preserving convs
    assert all(kk == 2 * pp + 1 for kk, pp in
               zip(cfg["fft_conv1d_kernel"], cfg["fft_conv1d_padding"]))

    key = jax.random.PRNGKey(0)
    k_seq, k_par = jax.random.split(key)
    enc_seq = jax.random.normal(k_seq, (B, T, cfg["d_model"]), jnp.float32)

    # positions: 1..len for real tokens, pad (=0) afterwards
    lengths = jnp.array([T, T - 4], jnp.int32)
    t_ids = jnp.arange(1, T + 1, dtype=jnp.int32)[None, :]
    enc_pos = jnp.where(t_ids <= lengths[:, None], t_ids, cfg["pad"]).astype(jnp.int32)

    params = init_decoder_params(k_par, cfg)
    ref = decoder_reference(enc_seq, enc_pos, params, cfg)

    # f32 matmul operands: tight numerical check against the reference
    out = decoder_forward(enc_seq, enc_pos, params, cfg, compute_dtype=jnp.float32)
    out = jax.block_until_ready(out)
    assert out.shape == (B, T, cfg["d_model"])
    np.testing.assert_allclose(np.asarray(out), np.asarray(ref), rtol=1e-3, atol=1e-4)

    # bf16 MXU-operand path (native matmul dtype on v5e/v6e/v7x; VPU/EUP math stays f32)
    out_bf16 = decoder_forward(enc_seq, enc_pos, params, cfg, compute_dtype=jnp.bfloat16)
    out_bf16 = jax.block_until_ready(out_bf16)
    np.testing.assert_allclose(np.asarray(out_bf16), np.asarray(ref), rtol=2e-1, atol=2e-1)

    print("KERNEL_OK")
</pallas_src>

<mosaic_0001>
module attributes {stable_mosaic.version = 11 : i64} {
  func.func @kernel(%arg0: i32, %arg1: i32, %arg2: memref<32x128xf32, #tpu.memory_space<vmem>>, %arg3: memref<32x1xf32, #tpu.memory_space<vmem>>, %arg4: memref<32x1xi32, #tpu.memory_space<vmem>>, %arg5: memref<2x1x16xf32, #tpu.memory_space<vmem>>, %arg6: memref<1x128x384xf32, #tpu.memory_space<vmem>>, %arg7: memref<1x1x384xf32, #tpu.memory_space<vmem>>, %arg8: memref<1x32x128xf32, #tpu.memory_space<vmem>>, %arg9: memref<1x1x128xf32, #tpu.memory_space<vmem>>, %arg10: memref<1x1x128xf32, #tpu.memory_space<vmem>>, %arg11: memref<1x1x128xf32, #tpu.memory_space<vmem>>, %arg12: memref<1x384x128xf32, #tpu.memory_space<vmem>>, %arg13: memref<1x1x128xf32, #tpu.memory_space<vmem>>, %arg14: memref<1x128x128xf32, #tpu.memory_space<vmem>>, %arg15: memref<1x1x128xf32, #tpu.memory_space<vmem>>, %arg16: memref<1x1x128xf32, #tpu.memory_space<vmem>>, %arg17: memref<1x1x128xf32, #tpu.memory_space<vmem>>, %arg18: memref<32x128xf32, #tpu.memory_space<vmem>>, %arg19: memref<32x128xf32, #tpu.memory_space<vmem>>) attributes {dimension_semantics = [#tpu.dimension_semantics<parallel>, #tpu.dimension_semantics<arbitrary>], iteration_bounds = array<i64: 1, 2>, scalar_prefetch = 0 : i64, scratch_operands = 1 : i64, tpu.core_type = #tpu.core_type<tc>, window_params = [{transform_indices = @transform_0, window_bounds = array<i64: 32, 128>}, {transform_indices = @transform_1, window_bounds = array<i64: 32, 1>}, {pipeline_mode = #tpu.pipeline_mode<synchronous>, transform_indices = @transform_2, window_bounds = array<i64: 32, 1>}, {transform_indices = @transform_3, window_bounds = array<i64: 2, 1, 16>}, {transform_indices = @transform_4, window_bounds = array<i64: 1, 128, 384>}, {transform_indices = @transform_5, window_bounds = array<i64: 1, 1, 384>}, {transform_indices = @transform_6, window_bounds = array<i64: 1, 32, 128>}, {transform_indices = @transform_7, window_bounds = array<i64: 1, 1, 128>}, {transform_indices = @transform_8, window_bounds = array<i64: 1, 1, 128>}, {transform_indices = @transform_9, window_bounds = array<i64: 1, 1, 128>}, {transform_indices = @transform_10, window_bounds = array<i64: 1, 384, 128>}, {transform_indices = @transform_11, window_bounds = array<i64: 1, 1, 128>}, {transform_indices = @transform_12, window_bounds = array<i64: 1, 128, 128>}, {transform_indices = @transform_13, window_bounds = array<i64: 1, 1, 128>}, {transform_indices = @transform_14, window_bounds = array<i64: 1, 1, 128>}, {transform_indices = @transform_15, window_bounds = array<i64: 1, 1, 128>}, {transform_indices = @transform_16, window_bounds = array<i64: 32, 128>}]} {
    %c0_i32 = arith.constant 0 : i32
    %0 = arith.cmpi eq, %arg1, %c0_i32 : i32
    %1 = arith.extui %0 : i1 to i32
    %c0_i32_0 = arith.constant 0 : i32
    %2 = arith.cmpi ne, %1, %c0_i32_0 : i32
    scf.if %2 {
      %c0_90 = arith.constant 0 : index
      %c0_91 = arith.constant 0 : index
      %207 = vector.load %arg2[%c0_90, %c0_91] : memref<32x128xf32, #tpu.memory_space<vmem>>, vector<32x128xf32>
      %c0_92 = arith.constant 0 : index
      %c0_93 = arith.constant 0 : index
      %208 = vector.load %arg19[%c0_92, %c0_93] : memref<32x128xf32, #tpu.memory_space<vmem>>, vector<32x128xf32>
      tpu.vector_store %arg19[%c0_92, %c0_93], %207 {strides = array<i32>} : memref<32x128xf32, #tpu.memory_space<vmem>>, vector<32x128xf32>,
    } else {
    }
    %c0 = arith.constant 0 : index
    %c0_1 = arith.constant 0 : index
    %3 = vector.load %arg19[%c0, %c0_1] : memref<32x128xf32, #tpu.memory_space<vmem>>, vector<32x128xf32>
    %c0_2 = arith.constant 0 : index
    %c0_3 = arith.constant 0 : index
    %4 = vector.load %arg3[%c0_2, %c0_3] : memref<32x1xf32, #tpu.memory_space<vmem>>, vector<32x1xf32>
    %c0_4 = arith.constant 0 : index
    %c0_5 = arith.constant 0 : index
    %5 = vector.load %arg4[%c0_4, %c0_5] : memref<32x1xi32, #tpu.memory_space<vmem>>, vector<32x1xi32>
    %6 = tpu.iota {dimensions = array<i32: 1>} : vector<1x128xi32>
    %c32_i32 = arith.constant 32 : i32
    %7 = vector.broadcast %c32_i32 : i32 to vector<1x128xi32>
    %8 = arith.cmpi slt, %6, %7 : vector<1x128xi32>
    %9 = arith.extui %8 : vector<1x128xi1> to vector<1x128xi32>
    %10 = arith.sitofp %9 : vector<1x128xi32> to vector<1x128xf32>
    %c0_6 = arith.constant 0 : index
    %c0_7 = arith.constant 0 : index
    %c0_8 = arith.constant 0 : index
    %11 = vector.load %arg6[%c0_6, %c0_7, %c0_8] : memref<1x128x384xf32, #tpu.memory_space<vmem>>, vector<1x128x384xf32>
    %12 = vector.shape_cast %11 : vector<1x128x384xf32> to vector<128x384xf32>
    %cst = arith.constant dense<0.000000e+00> : vector<32x384xf32>
    %13 = tpu.matmul %3, %12, %cst {dimension_numbers = #tpu.dot_dimension_numbers<[1], [0], [0], [1], [0, 0, 1, 1], [], []>} : vector<32x128xf32>, vector<128x384xf32>, vector<32x384xf32> -> vector<32x384xf32>
    %c0_9 = arith.constant 0 : index
    %c0_10 = arith.constant 0 : index
    %c0_11 = arith.constant 0 : index
    %14 = vector.load %arg7[%c0_9, %c0_10, %c0_11] : memref<1x1x384xf32, #tpu.memory_space<vmem>>, vector<1x1x384xf32>
    %15 = vector.shape_cast %14 : vector<1x1x384xf32> to vector<1x384xf32>
    %16 = vector.broadcast %15 : vector<1x384xf32> to vector<32x384xf32>
    %17 = arith.addf %13, %16 : vector<32x384xf32>
    %c0_12 = arith.constant 0 : index
    %c0_13 = arith.constant 0 : index
    %c0_14 = arith.constant 0 : index
    %18 = vector.load %arg5[%c0_12, %c0_13, %c0_14] : memref<2x1x16xf32, #tpu.memory_space<vmem>>, vector<1x1x16xf32>
    %19 = vector.shape_cast %18 : vector<1x1x16xf32> to vector<1x16xf32>
    %20 = vector.extract_strided_slice %17 {offsets = [0, 0], sizes = [16, 16], strides = [1, 1]} : vector<32x384xf32> to vector<16x16xf32>
    %21 = vector.extract_strided_slice %17 {offsets = [0, 128], sizes = [16, 16], strides = [1, 1]} : vector<32x384xf32> to vector<16x16xf32>
    %22 = vector.extract_strided_slice %17 {offsets = [0, 256], sizes = [16, 16], strides = [1, 1]} : vector<32x384xf32> to vector<16x16xf32>
    %cst_15 = arith.constant dense<0.000000e+00> : vector<16x16xf32>
    %23 = tpu.matmul %20, %21, %cst_15 {dimension_numbers = #tpu.dot_dimension_numbers<[1], [1], [0], [0], [0, 0, 1, 0], [], []>} : vector<16x16xf32>, vector<16x16xf32>, vector<16x16xf32> -> vector<16x16xf32>
    %24 = vector.broadcast %19 : vector<1x16xf32> to vector<16x16xf32>
    %25 = arith.addf %23, %24 : vector<16x16xf32>
    %cst_16 = arith.constant dense<0xFF800000> : vector<16xf32>
    %26 = vector.multi_reduction <maximumf>, %25, %cst_16 [1] : vector<16x16xf32> to vector<16xf32>
    %27 = vector.shape_cast %26 : vector<16xf32> to vector<16x1xf32>
    %28 = vector.broadcast %27 : vector<16x1xf32> to vector<16x16xf32>
    %29 = arith.subf %25, %28 : vector<16x16xf32>
    %30 = math.exp %29 : vector<16x16xf32>
    %cst_17 = arith.constant dense<0.000000e+00> : vector<16xf32>
    %31 = vector.multi_reduction <add>, %30, %cst_17 [1] : vector<16x16xf32> to vector<16xf32>
    %32 = vector.shape_cast %31 : vector<16xf32> to vector<16x1xf32>
    %cst_18 = arith.constant dense<0.000000e+00> : vector<16x16xf32>
    %33 = tpu.matmul %30, %22, %cst_18 {dimension_numbers = #tpu.dot_dimension_numbers<[1], [0], [0], [1], [0, 0, 1, 1], [], []>} : vector<16x16xf32>, vector<16x16xf32>, vector<16x16xf32> -> vector<16x16xf32>
    %34 = vector.broadcast %32 : vector<16x1xf32> to vector<16x16xf32>
    %35 = arith.divf %33, %34 : vector<16x16xf32>
    %36 = vector.extract_strided_slice %17 {offsets = [0, 16], sizes = [16, 16], strides = [1, 1]} : vector<32x384xf32> to vector<16x16xf32>
    %37 = vector.extract_strided_slice %17 {offsets = [0, 144], sizes = [16, 16], strides = [1, 1]} : vector<32x384xf32> to vector<16x16xf32>
    %38 = vector.extract_strided_slice %17 {offsets = [0, 272], sizes = [16, 16], strides = [1, 1]} : vector<32x384xf32> to vector<16x16xf32>
    %cst_19 = arith.constant dense<0.000000e+00> : vector<16x16xf32>
    %39 = tpu.matmul %36, %37, %cst_19 {dimension_numbers = #tpu.dot_dimension_numbers<[1], [1], [0], [0], [0, 0, 1, 0], [], []>} : vector<16x16xf32>, vector<16x16xf32>, vector<16x16xf32> -> vector<16x16xf32>
    %40 = vector.broadcast %19 : vector<1x16xf32> to vector<16x16xf32>
    %41 = arith.addf %39, %40 : vector<16x16xf32>
    %cst_20 = arith.constant dense<0xFF800000> : vector<16xf32>
    %42 = vector.multi_reduction <maximumf>, %41, %cst_20 [1] : vector<16x16xf32> to vector<16xf32>
    %43 = vector.shape_cast %42 : vector<16xf32> to vector<16x1xf32>
    %44 = vector.broadcast %43 : vector<16x1xf32> to vector<16x16xf32>
    %45 = arith.subf %41, %44 : vector<16x16xf32>
    %46 = math.exp %45 : vector<16x16xf32>
    %cst_21 = arith.constant dense<0.000000e+00> : vector<16xf32>
    %47 = vector.multi_reduction <add>, %46, %cst_21 [1] : vector<16x16xf32> to vector<16xf32>
    %48 = vector.shape_cast %47 : vector<16xf32> to vector<16x1xf32>
    %cst_22 = arith.constant dense<0.000000e+00> : vector<16x16xf32>
    %49 = tpu.matmul %46, %38, %cst_22 {dimension_numbers = #tpu.dot_dimension_numbers<[1], [0], [0], [1], [0, 0, 1, 1], [], []>} : vector<16x16xf32>, vector<16x16xf32>, vector<16x16xf32> -> vector<16x16xf32>
    %50 = vector.broadcast %48 : vector<16x1xf32> to vector<16x16xf32>
    %51 = arith.divf %49, %50 : vector<16x16xf32>
    %52 = tpu.concatenate %35, %51 in 1 : vector<16x16xf32>, vector<16x16xf32> -> vector<16x32xf32>
    %c1 = arith.constant 1 : index
    %c0_23 = arith.constant 0 : index
    %c0_24 = arith.constant 0 : index
    %53 = vector.load %arg5[%c1, %c0_23, %c0_24] : memref<2x1x16xf32, #tpu.memory_space<vmem>>, vector<1x1x16xf32>
    %54 = vector.shape_cast %53 : vector<1x1x16xf32> to vector<1x16xf32>
    %55 = vector.extract_strided_slice %17 {offsets = [16, 0], sizes = [16, 16], strides = [1, 1]} : vector<32x384xf32> to vector<16x16xf32>
    %56 = vector.extract_strided_slice %17 {offsets = [16, 128], sizes = [16, 16], strides = [1, 1]} : vector<32x384xf32> to vector<16x16xf32>
    %57 = vector.extract_strided_slice %17 {offsets = [16, 256], sizes = [16, 16], strides = [1, 1]} : vector<32x384xf32> to vector<16x16xf32>
    %cst_25 = arith.constant dense<0.000000e+00> : vector<16x16xf32>
    %58 = tpu.matmul %55, %56, %cst_25 {dimension_numbers = #tpu.dot_dimension_numbers<[1], [1], [0], [0], [0, 0, 1, 0], [], []>} : vector<16x16xf32>, vector<16x16xf32>, vector<16x16xf32> -> vector<16x16xf32>
    %59 = vector.broadcast %54 : vector<1x16xf32> to vector<16x16xf32>
    %60 = arith.addf %58, %59 : vector<16x16xf32>
    %cst_26 = arith.constant dense<0xFF800000> : vector<16xf32>
    %61 = vector.multi_reduction <maximumf>, %60, %cst_26 [1] : vector<16x16xf32> to vector<16xf32>
    %62 = vector.shape_cast %61 : vector<16xf32> to vector<16x1xf32>
    %63 = vector.broadcast %62 : vector<16x1xf32> to vector<16x16xf32>
    %64 = arith.subf %60, %63 : vector<16x16xf32>
    %65 = math.exp %64 : vector<16x16xf32>
    %cst_27 = arith.constant dense<0.000000e+00> : vector<16xf32>
    %66 = vector.multi_reduction <add>, %65, %cst_27 [1] : vector<16x16xf32> to vector<16xf32>
    %67 = vector.shape_cast %66 : vector<16xf32> to vector<16x1xf32>
    %cst_28 = arith.constant dense<0.000000e+00> : vector<16x16xf32>
    %68 = tpu.matmul %65, %57, %cst_28 {dimension_numbers = #tpu.dot_dimension_numbers<[1], [0], [0], [1], [0, 0, 1, 1], [], []>} : vector<16x16xf32>, vector<16x16xf32>, vector<16x16xf32> -> vector<16x16xf32>
    %69 = vector.broadcast %67 : vector<16x1xf32> to vector<16x16xf32>
    %70 = arith.divf %68, %69 : vector<16x16xf32>
    %71 = vector.extract_strided_slice %17 {offsets = [16, 16], sizes = [16, 16], strides = [1, 1]} : vector<32x384xf32> to vector<16x16xf32>
    %72 = vector.extract_strided_slice %17 {offsets = [16, 144], sizes = [16, 16], strides = [1, 1]} : vector<32x384xf32> to vector<16x16xf32>
    %73 = vector.extract_strided_slice %17 {offsets = [16, 272], sizes = [16, 16], strides = [1, 1]} : vector<32x384xf32> to vector<16x16xf32>
    %cst_29 = arith.constant dense<0.000000e+00> : vector<16x16xf32>
    %74 = tpu.matmul %71, %72, %cst_29 {dimension_numbers = #tpu.dot_dimension_numbers<[1], [1], [0], [0], [0, 0, 1, 0], [], []>} : vector<16x16xf32>, vector<16x16xf32>, vector<16x16xf32> -> vector<16x16xf32>
    %75 = vector.broadcast %54 : vector<1x16xf32> to vector<16x16xf32>
    %76 = arith.addf %74, %75 : vector<16x16xf32>
    %cst_30 = arith.constant dense<0xFF800000> : vector<16xf32>
    %77 = vector.multi_reduction <maximumf>, %76, %cst_30 [1] : vector<16x16xf32> to vector<16xf32>
    %78 = vector.shape_cast %77 : vector<16xf32> to vector<16x1xf32>
    %79 = vector.broadcast %78 : vector<16x1xf32> to vector<16x16xf32>
    %80 = arith.subf %76, %79 : vector<16x16xf32>
    %81 = math.exp %80 : vector<16x16xf32>
    %cst_31 = arith.constant dense<0.000000e+00> : vector<16xf32>
    %82 = vector.multi_reduction <add>, %81, %cst_31 [1] : vector<16x16xf32> to vector<16xf32>
    %83 = vector.shape_cast %82 : vector<16xf32> to vector<16x1xf32>
    %cst_32 = arith.constant dense<0.000000e+00> : vector<16x16xf32>
    %84 = tpu.matmul %81, %73, %cst_32 {dimension_numbers = #tpu.dot_dimension_numbers<[1], [0], [0], [1], [0, 0, 1, 1], [], []>} : vector<16x16xf32>, vector<16x16xf32>, vector<16x16xf32> -> vector<16x16xf32>
    %85 = vector.broadcast %83 : vector<16x1xf32> to vector<16x16xf32>
    %86 = arith.divf %84, %85 : vector<16x16xf32>
    %87 = tpu.concatenate %70, %86 in 1 : vector<16x16xf32>, vector<16x16xf32> -> vector<16x32xf32>
    %88 = tpu.concatenate %52, %87 in 0 : vector<16x32xf32>, vector<16x32xf32> -> vector<32x32xf32>
    %c0_33 = arith.constant 0 : index
    %c0_34 = arith.constant 0 : index
    %c0_35 = arith.constant 0 : index
    %89 = vector.load %arg8[%c0_33, %c0_34, %c0_35] : memref<1x32x128xf32, #tpu.memory_space<vmem>>, vector<1x32x128xf32>
    %90 = vector.shape_cast %89 : vector<1x32x128xf32> to vector<32x128xf32>
    %cst_36 = arith.constant dense<0.000000e+00> : vector<32x128xf32>
    %91 = tpu.matmul %88, %90, %cst_36 {dimension_numbers = #tpu.dot_dimension_numbers<[1], [0], [0], [1], [0, 0, 1, 1], [], []>} : vector<32x32xf32>, vector<32x128xf32>, vector<32x128xf32> -> vector<32x128xf32>
    %c0_37 = arith.constant 0 : index
    %c0_38 = arith.constant 0 : index
    %c0_39 = arith.constant 0 : index
    %92 = vector.load %arg9[%c0_37, %c0_38, %c0_39] : memref<1x1x128xf32, #tpu.memory_space<vmem>>, vector<1x1x128xf32>
    %93 = vector.shape_cast %92 : vector<1x1x128xf32> to vector<1x128xf32>
    %94 = vector.broadcast %93 : vector<1x128xf32> to vector<32x128xf32>
    %95 = arith.addf %91, %94 : vector<32x128xf32>
    %96 = arith.addf %95, %3 : vector<32x128xf32>
    %c0_40 = arith.constant 0 : index
    %c0_41 = arith.constant 0 : index
    %c0_42 = arith.constant 0 : index
    %97 = vector.load %arg10[%c0_40, %c0_41, %c0_42] : memref<1x1x128xf32, #tpu.memory_space<vmem>>, vector<1x1x128xf32>
    %98 = vector.shape_cast %97 : vector<1x1x128xf32> to vector<1x128xf32>
    %c0_43 = arith.constant 0 : index
    %c0_44 = arith.constant 0 : index
    %c0_45 = arith.constant 0 : index
    %99 = vector.load %arg11[%c0_43, %c0_44, %c0_45] : memref<1x1x128xf32, #tpu.memory_space<vmem>>, vector<1x1x128xf32>
    %100 = vector.shape_cast %99 : vector<1x1x128xf32> to vector<1x128xf32>
    %cst_46 = arith.constant dense<0.000000e+00> : vector<32xf32>
    %101 = vector.multi_reduction <add>, %96, %cst_46 [1] : vector<32x128xf32> to vector<32xf32>
    %102 = vector.shape_cast %101 : vector<32xf32> to vector<32x1xf32>
    %cst_47 = arith.constant 3.125000e-02 : f32
    %103 = vector.broadcast %cst_47 : f32 to vector<32x1xf32>
    %104 = arith.mulf %102, %103 : vector<32x1xf32>
    %105 = vector.broadcast %104 : vector<32x1xf32> to vector<32x128xf32>
    %106 = arith.subf %96, %105 : vector<32x128xf32>
    %107 = vector.broadcast %10 : vector<1x128xf32> to vector<32x128xf32>
    %108 = arith.mulf %106, %107 : vector<32x128xf32>
    %109 = arith.mulf %108, %108 : vector<32x128xf32>
    %cst_48 = arith.constant dense<0.000000e+00> : vector<32xf32>
    %110 = vector.multi_reduction <add>, %109, %cst_48 [1] : vector<32x128xf32> to vector<32xf32>
    %111 = vector.shape_cast %110 : vector<32xf32> to vector<32x1xf32>
    %cst_49 = arith.constant 3.125000e-02 : f32
    %112 = vector.broadcast %cst_49 : f32 to vector<32x1xf32>
    %113 = arith.mulf %111, %112 : vector<32x1xf32>
    %cst_50 = arith.constant 9.99999974E-6 : f32
    %114 = vector.broadcast %cst_50 : f32 to vector<32x1xf32>
    %115 = arith.addf %113, %114 : vector<32x1xf32>
    %116 = math.rsqrt %115 : vector<32x1xf32>
    %117 = vector.broadcast %116 : vector<32x1xf32> to vector<32x128xf32>
    %118 = arith.mulf %108, %117 : vector<32x128xf32>
    %119 = vector.broadcast %98 : vector<1x128xf32> to vector<32x128xf32>
    %120 = arith.mulf %118, %119 : vector<32x128xf32>
    %121 = vector.broadcast %100 : vector<1x128xf32> to vector<32x128xf32>
    %122 = arith.addf %120, %121 : vector<32x128xf32>
    %123 = vector.broadcast %4 : vector<32x1xf32> to vector<32x128xf32>
    %124 = arith.mulf %122, %123 : vector<32x128xf32>
    %cst_51 = arith.constant 0.000000e+00 : f32
    %125 = vector.broadcast %cst_51 : f32 to vector<1x128xf32>
    %126 = vector.extract_strided_slice %124 {offsets = [0, 0], sizes = [31, 128], strides = [1, 1]} : vector<32x128xf32> to vector<31x128xf32>
    %127 = tpu.concatenate %125, %126 in 0 : vector<1x128xf32>, vector<31x128xf32> -> vector<32x128xf32>
    %c-1_i32 = arith.constant -1 : i32
    %128 = vector.broadcast %c-1_i32 : i32 to vector<32x1xi32>
    %129 = arith.addi %5, %128 : vector<32x1xi32>
    %c0_i32_52 = arith.constant 0 : i32
    %130 = vector.broadcast %c0_i32_52 : i32 to vector<32x1xi32>
    %131 = arith.cmpi sge, %129, %130 : vector<32x1xi32>
    %c-1_i32_53 = arith.constant -1 : i32
    %132 = vector.broadcast %c-1_i32_53 : i32 to vector<32x1xi32>
    %133 = arith.addi %5, %132 : vector<32x1xi32>
    %c16_i32 = arith.constant 16 : i32
    %134 = vector.broadcast %c16_i32 : i32 to vector<32x1xi32>
    %135 = arith.cmpi slt, %133, %134 : vector<32x1xi32>
    %136 = arith.andi %131, %135 : vector<32x1xi1>
    %cst_54 = arith.constant 0.000000e+00 : f32
    %137 = vector.shape_cast %136 : vector<32x1xi1> to vector<32x1xi1>
    %138 = vector.broadcast %137 : vector<32x1xi1> to vector<32x128xi1>
    %139 = vector.broadcast %cst_54 : f32 to vector<32x128xf32>
    %140 = arith.select %138, %127, %139 : vector<32x128xi1>, vector<32x128xf32>
    %cst_55 = arith.constant 0.000000e+00 : f32
    %141 = vector.broadcast %cst_55 : f32 to vector<1x128xf32>
    %142 = vector.extract_strided_slice %124 {offsets = [1, 0], sizes = [31, 128], strides = [1, 1]} : vector<32x128xf32> to vector<31x128xf32>
    %143 = tpu.concatenate %142, %141 in 0 : vector<31x128xf32>, vector<1x128xf32> -> vector<32x128xf32>
    %c1_i32 = arith.constant 1 : i32
    %144 = vector.broadcast %c1_i32 : i32 to vector<32x1xi32>
    %145 = arith.addi %5, %144 : vector<32x1xi32>
    %c0_i32_56 = arith.constant 0 : i32
    %146 = vector.broadcast %c0_i32_56 : i32 to vector<32x1xi32>
    %147 = arith.cmpi sge, %145, %146 : vector<32x1xi32>
    %c1_i32_57 = arith.constant 1 : i32
    %148 = vector.broadcast %c1_i32_57 : i32 to vector<32x1xi32>
    %149 = arith.addi %5, %148 : vector<32x1xi32>
    %c16_i32_58 = arith.constant 16 : i32
    %150 = vector.broadcast %c16_i32_58 : i32 to vector<32x1xi32>
    %151 = arith.cmpi slt, %149, %150 : vector<32x1xi32>
    %152 = arith.andi %147, %151 : vector<32x1xi1>
    %cst_59 = arith.constant 0.000000e+00 : f32
    %153 = vector.shape_cast %152 : vector<32x1xi1> to vector<32x1xi1>
    %154 = vector.broadcast %153 : vector<32x1xi1> to vector<32x128xi1>
    %155 = vector.broadcast %cst_59 : f32 to vector<32x128xf32>
    %156 = arith.select %154, %143, %155 : vector<32x128xi1>, vector<32x128xf32>
    %157 = tpu.concatenate %140, %124, %156 in 1 : vector<32x128xf32>, vector<32x128xf32>, vector<32x128xf32> -> vector<32x384xf32>
    %c0_60 = arith.constant 0 : index
    %c0_61 = arith.constant 0 : index
    %c0_62 = arith.constant 0 : index
    %158 = vector.load %arg12[%c0_60, %c0_61, %c0_62] : memref<1x384x128xf32, #tpu.memory_space<vmem>>, vector<1x384x128xf32>
    %159 = vector.shape_cast %158 : vector<1x384x128xf32> to vector<384x128xf32>
    %cst_63 = arith.constant dense<0.000000e+00> : vector<32x128xf32>
    %160 = tpu.matmul %157, %159, %cst_63 {dimension_numbers = #tpu.dot_dimension_numbers<[1], [0], [0], [1], [0, 0, 1, 1], [], []>} : vector<32x384xf32>, vector<384x128xf32>, vector<32x128xf32> -> vector<32x128xf32>
    %c0_64 = arith.constant 0 : index
    %c0_65 = arith.constant 0 : index
    %c0_66 = arith.constant 0 : index
    %161 = vector.load %arg13[%c0_64, %c0_65, %c0_66] : memref<1x1x128xf32, #tpu.memory_space<vmem>>, vector<1x1x128xf32>
    %162 = vector.shape_cast %161 : vector<1x1x128xf32> to vector<1x128xf32>
    %163 = vector.broadcast %162 : vector<1x128xf32> to vector<32x128xf32>
    %164 = arith.addf %160, %163 : vector<32x128xf32>
    %cst_67 = arith.constant 0.000000e+00 : f32
    %165 = vector.broadcast %cst_67 : f32 to vector<32x128xf32>
    %166 = arith.maximumf %164, %165 : vector<32x128xf32>
    %c0_68 = arith.constant 0 : index
    %c0_69 = arith.constant 0 : index
    %c0_70 = arith.constant 0 : index
    %167 = vector.load %arg14[%c0_68, %c0_69, %c0_70] : memref<1x128x128xf32, #tpu.memory_space<vmem>>, vector<1x128x128xf32>
    %168 = vector.shape_cast %167 : vector<1x128x128xf32> to vector<128x128xf32>
    %cst_71 = arith.constant dense<0.000000e+00> : vector<32x128xf32>
    %169 = tpu.matmul %166, %168, %cst_71 {dimension_numbers = #tpu.dot_dimension_numbers<[1], [0], [0], [1], [0, 0, 1, 1], [], []>} : vector<32x128xf32>, vector<128x128xf32>, vector<32x128xf32> -> vector<32x128xf32>
    %c0_72 = arith.constant 0 : index
    %c0_73 = arith.constant 0 : index
    %c0_74 = arith.constant 0 : index
    %170 = vector.load %arg15[%c0_72, %c0_73, %c0_74] : memref<1x1x128xf32, #tpu.memory_space<vmem>>, vector<1x1x128xf32>
    %171 = vector.shape_cast %170 : vector<1x1x128xf32> to vector<1x128xf32>
    %172 = vector.broadcast %171 : vector<1x128xf32> to vector<32x128xf32>
    %173 = arith.addf %169, %172 : vector<32x128xf32>
    %174 = arith.addf %173, %124 : vector<32x128xf32>
    %c0_75 = arith.constant 0 : index
    %c0_76 = arith.constant 0 : index
    %c0_77 = arith.constant 0 : index
    %175 = vector.load %arg16[%c0_75, %c0_76, %c0_77] : memref<1x1x128xf32, #tpu.memory_space<vmem>>, vector<1x1x128xf32>
    %176 = vector.shape_cast %175 : vector<1x1x128xf32> to vector<1x128xf32>
    %c0_78 = arith.constant 0 : index
    %c0_79 = arith.constant 0 : index
    %c0_80 = arith.constant 0 : index
    %177 = vector.load %arg17[%c0_78, %c0_79, %c0_80] : memref<1x1x128xf32, #tpu.memory_space<vmem>>, vector<1x1x128xf32>
    %178 = vector.shape_cast %177 : vector<1x1x128xf32> to vector<1x128xf32>
    %cst_81 = arith.constant dense<0.000000e+00> : vector<32xf32>
    %179 = vector.multi_reduction <add>, %174, %cst_81 [1] : vector<32x128xf32> to vector<32xf32>
    %180 = vector.shape_cast %179 : vector<32xf32> to vector<32x1xf32>
    %cst_82 = arith.constant 3.125000e-02 : f32
    %181 = vector.broadcast %cst_82 : f32 to vector<32x1xf32>
    %182 = arith.mulf %180, %181 : vector<32x1xf32>
    %183 = vector.broadcast %182 : vector<32x1xf32> to vector<32x128xf32>
    %184 = arith.subf %174, %183 : vector<32x128xf32>
    %185 = vector.broadcast %10 : vector<1x128xf32> to vector<32x128xf32>
    %186 = arith.mulf %184, %185 : vector<32x128xf32>
    %187 = arith.mulf %186, %186 : vector<32x128xf32>
    %cst_83 = arith.constant dense<0.000000e+00> : vector<32xf32>
    %188 = vector.multi_reduction <add>, %187, %cst_83 [1] : vector<32x128xf32> to vector<32xf32>
    %189 = vector.shape_cast %188 : vector<32xf32> to vector<32x1xf32>
    %cst_84 = arith.constant 3.125000e-02 : f32
    %190 = vector.broadcast %cst_84 : f32 to vector<32x1xf32>
    %191 = arith.mulf %189, %190 : vector<32x1xf32>
    %cst_85 = arith.constant 9.99999974E-6 : f32
    %192 = vector.broadcast %cst_85 : f32 to vector<32x1xf32>
    %193 = arith.addf %191, %192 : vector<32x1xf32>
    %194 = math.rsqrt %193 : vector<32x1xf32>
    %195 = vector.broadcast %194 : vector<32x1xf32> to vector<32x128xf32>
    %196 = arith.mulf %186, %195 : vector<32x128xf32>
    %197 = vector.broadcast %176 : vector<1x128xf32> to vector<32x128xf32>
    %198 = arith.mulf %196, %197 : vector<32x128xf32>
    %199 = vector.broadcast %178 : vector<1x128xf32> to vector<32x128xf32>
    %200 = arith.addf %198, %199 : vector<32x128xf32>
    %201 = vector.broadcast %4 : vector<32x1xf32> to vector<32x128xf32>
    %202 = arith.mulf %200, %201 : vector<32x128xf32>
    %c0_86 = arith.constant 0 : index
    %c0_87 = arith.constant 0 : index
    %203 = vector.load %arg19[%c0_86, %c0_87] : memref<32x128xf32, #tpu.memory_space<vmem>>, vector<32x128xf32>
    tpu.vector_store %arg19[%c0_86, %c0_87], %202 {strides = array<i32>} : memref<32x128xf32, #tpu.memory_space<vmem>>, vector<32x128xf32>,
    %c1_i32_88 = arith.constant 1 : i32
    %204 = arith.cmpi eq, %arg1, %c1_i32_88 : i32
    %205 = arith.extui %204 : i1 to i32
    %c0_i32_89 = arith.constant 0 : i32
    %206 = arith.cmpi ne, %205, %c0_i32_89 : i32
    scf.if %206 {
      %c0_90 = arith.constant 0 : index
      %c0_91 = arith.constant 0 : index
      %207 = vector.load %arg18[%c0_90, %c0_91] : memref<32x128xf32, #tpu.memory_space<vmem>>, vector<32x128xf32>
      tpu.vector_store %arg18[%c0_90, %c0_91], %202 {strides = array<i32>} : memref<32x128xf32, #tpu.memory_space<vmem>>, vector<32x128xf32>,
    } else {
    }
    return
  }
  func.func @transform_0(%arg0: i32, %arg1: i32) -> (i32, i32) {
    %c0_i32 = arith.constant 0 : i32
    %c0_i32_0 = arith.constant 0 : i32
    return %arg0, %c0_i32 : i32, i32
  }
  func.func @transform_1(%arg0: i32, %arg1: i32) -> (i32, i32) {
    %c0_i32 = arith.constant 0 : i32
    %c0_i32_0 = arith.constant 0 : i32
    return %arg0, %c0_i32 : i32, i32
  }
  func.func @transform_2(%arg0: i32, %arg1: i32) -> (i32, i32) {
    %c0_i32 = arith.constant 0 : i32
    %c0_i32_0 = arith.constant 0 : i32
    %c0_i32_1 = arith.constant 0 : i32
    return %c0_i32, %c0_i32_0 : i32, i32
  }
  func.func @transform_3(%arg0: i32, %arg1: i32) -> (i32, i32, i32) {
    %c0_i32 = arith.constant 0 : i32
    %c0_i32_0 = arith.constant 0 : i32
    %c0_i32_1 = arith.constant 0 : i32
    return %arg0, %c0_i32, %c0_i32_0 : i32, i32, i32
  }
  func.func @transform_4(%arg0: i32, %arg1: i32) -> (i32, i32, i32) {
    %c0_i32 = arith.constant 0 : i32
    %c0_i32_0 = arith.constant 0 : i32
    %c0_i32_1 = arith.constant 0 : i32
    return %arg1, %c0_i32, %c0_i32_0 : i32, i32, i32
  }
  func.func @transform_5(%arg0: i32, %arg1: i32) -> (i32, i32, i32) {
    %c0_i32 = arith.constant 0 : i32
    %c0_i32_0 = arith.constant 0 : i32
    %c0_i32_1 = arith.constant 0 : i32
    return %arg1, %c0_i32, %c0_i32_0 : i32, i32, i32
  }
  func.func @transform_6(%arg0: i32, %arg1: i32) -> (i32, i32, i32) {
    %c0_i32 = arith.constant 0 : i32
    %c0_i32_0 = arith.constant 0 : i32
    %c0_i32_1 = arith.constant 0 : i32
    return %arg1, %c0_i32, %c0_i32_0 : i32, i32, i32
  }
  func.func @transform_7(%arg0: i32, %arg1: i32) -> (i32, i32, i32) {
    %c0_i32 = arith.constant 0 : i32
    %c0_i32_0 = arith.constant 0 : i32
    %c0_i32_1 = arith.constant 0 : i32
    return %arg1, %c0_i32, %c0_i32_0 : i32, i32, i32
  }
  func.func @transform_8(%arg0: i32, %arg1: i32) -> (i32, i32, i32) {
    %c0_i32 = arith.constant 0 : i32
    %c0_i32_0 = arith.constant 0 : i32
    %c0_i32_1 = arith.constant 0 : i32
    return %arg1, %c0_i32, %c0_i32_0 : i32, i32, i32
  }
  func.func @transform_9(%arg0: i32, %arg1: i32) -> (i32, i32, i32) {
    %c0_i32 = arith.constant 0 : i32
    %c0_i32_0 = arith.constant 0 : i32
    %c0_i32_1 = arith.constant 0 : i32
    return %arg1, %c0_i32, %c0_i32_0 : i32, i32, i32
  }
  func.func @transform_10(%arg0: i32, %arg1: i32) -> (i32, i32, i32) {
    %c0_i32 = arith.constant 0 : i32
    %c0_i32_0 = arith.constant 0 : i32
    %c0_i32_1 = arith.constant 0 : i32
    return %arg1, %c0_i32, %c0_i32_0 : i32, i32, i32
  }
  func.func @transform_11(%arg0: i32, %arg1: i32) -> (i32, i32, i32) {
    %c0_i32 = arith.constant 0 : i32
    %c0_i32_0 = arith.constant 0 : i32
    %c0_i32_1 = arith.constant 0 : i32
    return %arg1, %c0_i32, %c0_i32_0 : i32, i32, i32
  }
  func.func @transform_12(%arg0: i32, %arg1: i32) -> (i32, i32, i32) {
    %c0_i32 = arith.constant 0 : i32
    %c0_i32_0 = arith.constant 0 : i32
    %c0_i32_1 = arith.constant 0 : i32
    return %arg1, %c0_i32, %c0_i32_0 : i32, i32, i32
  }
  func.func @transform_13(%arg0: i32, %arg1: i32) -> (i32, i32, i32) {
    %c0_i32 = arith.constant 0 : i32
    %c0_i32_0 = arith.constant 0 : i32
    %c0_i32_1 = arith.constant 0 : i32
    return %arg1, %c0_i32, %c0_i32_0 : i32, i32, i32
  }
  func.func @transform_14(%arg0: i32, %arg1: i32) -> (i32, i32, i32) {
    %c0_i32 = arith.constant 0 : i32
    %c0_i32_0 = arith.constant 0 : i32
    %c0_i32_1 = arith.constant 0 : i32
    return %arg1, %c0_i32, %c0_i32_0 : i32, i32, i32
  }
  func.func @transform_15(%arg0: i32, %arg1: i32) -> (i32, i32, i32) {
    %c0_i32 = arith.constant 0 : i32
    %c0_i32_0 = arith.constant 0 : i32
    %c0_i32_1 = arith.constant 0 : i32
    return %arg1, %c0_i32, %c0_i32_0 : i32, i32, i32
  }
  func.func @transform_16(%arg0: i32, %arg1: i32) -> (i32, i32) {
    %c0_i32 = arith.constant 0 : i32
    %c0_i32_0 = arith.constant 0 : i32
    return %arg0, %c0_i32 : i32, i32
  }
}

</mosaic_0001>

<bundles_post_ra>
// kernel: tpu_custom_call.1
= control target key start
LH: loop header
LB: loop body
LE: loop exit
PB: predicated region body
PF: predicated region fallthrough
CT: control target
= control target key end

     0   :  { %s4732_s0 = inlined_call_operand.hbm [shape: f32[32,128], index: 0, kind: input, shape index: {}]   ;;  %s4733_s1 = inlined_call_operand.vmem [shape: f32[32,1], index: 1, kind: input, shape index: {}]   ;;  %s4734_s2 = inlined_call_operand.vmem [shape: s32[32,1], index: 2, kind: input, shape index: {}]   ;;  %s4735_s3 = inlined_call_operand.vmem [shape: f32[2,1,16], index: 3, kind: input, shape index: {}]   ;;  %s4736_s4 = inlined_call_operand.hbm [shape: f32[2,128,384], index: 4, kind: input, shape index: {}]   ;;  %s4737_s5 = inlined_call_operand.vmem [shape: f32[2,1,384], index: 5, kind: input, shape index: {}]   ;;  %s4738_s6 = inlined_call_operand.vmem [shape: f32[2,32,128], index: 6, kind: input, shape index: {}]   ;;  %s4739_s7 = inlined_call_operand.vmem [shape: f32[2,1,128], index: 7, kind: input, shape index: {}]   ;;  %s4740_s8 = inlined_call_operand.vmem [shape: f32[2,1,128], index: 8, kind: input, shape index: {}]   ;;  %s4741_s9 = inlined_call_operand.vmem [shape: f32[2,1,128], index: 9, kind: input, shape index: {}]   ;;  %s4742_s10 = inlined_call_operand.hbm [shape: f32[2,384,128], index: 10, kind: input, shape index: {}]   ;;  %s4743_s11 = inlined_call_operand.vmem [shape: f32[2,1,128], index: 11, kind: input, shape index: {}]   ;;  %s4744_s12 = inlined_call_operand.hbm [shape: f32[2,128,128], index: 12, kind: input, shape index: {}]   ;;  %s4745_s13 = inlined_call_operand.vmem [shape: f32[2,1,128], index: 13, kind: input, shape index: {}]   ;;  %s4746_s14 = inlined_call_operand.vmem [shape: f32[2,1,128], index: 14, kind: input, shape index: {}]   ;;  %s4747_s15 = inlined_call_operand.vmem [shape: f32[2,1,128], index: 15, kind: input, shape index: {}]   ;;  %s4748_s16 = inlined_call_operand.hbm [shape: f32[32,128], index: 16, kind: output, shape index: {}]  }
   0x1   :  { %4769 = sst [smem:[#allocation22_spill]] %s4732_s0 }
   0x2   :  { %4770 = sst [smem:[#allocation23_spill]] %s4733_s1 }
   0x3   :  { %4771 = sst [smem:[#allocation24_spill]] %s4734_s2 }
   0x4   :  { %4772 = sst [smem:[#allocation25_spill]] %s4735_s3 }
   0x5   :  { %4773 = sst [smem:[#allocation26_spill]] %s4736_s4 }
   0x6   :  { %4774 = sst [smem:[#allocation27_spill]] %s4737_s5 }
   0x7   :  { %4775 = sst [smem:[#allocation28_spill]] %s4738_s6 }
   0x8   :  { %4776 = sst [smem:[#allocation29_spill]] %s4741_s9 }
   0x9   :  { %4777 = sst [smem:[#allocation30_spill]] %s4742_s10 }
   0xa   :  { %4778 = sst [smem:[#allocation31_spill]] %s4743_s11 }
   0xb   :  { %4779 = sst [smem:[#allocation32_spill]] %s4744_s12 }
   0xc   :  { %4780 = sst [smem:[#allocation33_spill]] %s4745_s13 }
   0xd   :  { %4781 = sst [smem:[#allocation34_spill]] %s4746_s14 }
   0xe   :  { %4782 = sst [smem:[#allocation35_spill]] %s4747_s15 }
   0xf   :  { %4783 = sst [smem:[#allocation36_spill]] %s4748_s16 }
  0x10   :  { %21 = vsyncpa [#allocation4], 0 }
  0x11   :  { %22 = vsyncpa [#allocation7], 0 }
  0x12   :  { %24 = vsyncpa [#allocation7 + $0x1], 0 }
  0x13   :  { %25 = vsyncpa [#allocation10], 0 }
  0x14   :  { %27 = vsyncpa [#allocation10 + $0x1], 0 }
  0x15   :  { %28 = vsyncpa [#allocation5], 0  ;;  %s3983_s21 = smov 0   ;;  %s3985_s22 = smov 0  }
  0x16   :  { %s3987_s23 = smov 0   ;;  %s3989_s24 = smov 0  }
  0x17   :  { %s3991_s25 = smov 0   ;;  %s3993_s26 = smov 0  }
  0x18 LB: > { %4784 = sst [smem:[#allocation16_spill]] %s3865_s22  ;;  %s43_s27 = sadd.s32 1, %s3877_s25  ;;  %s3881_s26 = sphi %s3993_s26, %s34_s26   ;;  %s3877_s25 = sphi %s3991_s25, %s4836_s25   ;;  %s3873_s24 = sphi %s3989_s24, %s4835_s24   ;;  %s3869_s23 = sphi %s3987_s23, %s4834_s23   ;;  %s3865_s22 = sphi %s3985_s22, %s4833_s22   ;;  %s3861_s21 = sphi %s3983_s21, %s4832_s21  }
  0x19   : > { %4785 = sst [smem:[#allocation17_spill]] %s3869_s23  ;;  %s152_s28 = sadd.s32 1, %s3869_s23 }
  0x1a   : > { %4786 = sst [smem:[#allocation18_spill]] %s3877_s25  ;;  %p44_p0 = scmp.ge.s32.totalorder %s43_s27, 2 }
  0x1b   : > { %4787 = sst [smem:[#allocation19_spill]] %s3881_s26  ;;  %p159_p1 = scmp.ne.s32.totalorder %s3869_s23, %s3865_s22 }
  0x1c   : > { %p160_p2 = scmp.eq.s32.totalorder %s3881_s26, 0  ;;  %s4838_s27 = smov (%p44_p0, %s43_s27), 0 }
  0x1d   : > { %4788 = sst [smem:[#allocation20_spill]] %s4838_s27  ;;  %p3541_p4 = scmp.lt.s32.totalorder %s3881_s26, 2 }
  0x1e   : > { %p161_p3 = por %p160_p2, %p159_p1  ;;  %s149_s29 = ssub.s32 %s3877_s25, %s4838_s27 }
  0x1f   : > { %s537_s30 = sand.u32 1, %s3881_s26   ;;  %p150_p5 = scmp.eq.s32.totalorder %s149_s29, 0 }
  0x20   : > { %s4025_s0 = sand.u32 1, %s3869_s23   ;;  %s4754_s17 = smul.u32 6144, %s3877_s25 }
  0x21   : > { %s4029_s18 = scalar_select %p150_p5, %s3869_s23, %s152_s28  }
  0x22   : > { %s4755_s19 = smul.u32 384, %s4025_s0  ;;  %s4790_s4 = sld [smem:[#allocation26_spill]] }
  0x23   : > { %4789 = sst [smem:[#allocation21_spill]] %s4029_s18  ;;  %p4039_p6 = pnand %p3541_p4, %p161_p3 }
  0x24   : > { %s541_s27 = scalar_lea.vmem [#allocation6], %s4755_s19  ;;  %s4047_s18 = scalar_lea.sflag [#allocation7], %s537_s30 }
  0x25   : > { %s4791_s29 = scalar_select %p4039_p6, 1, 0 }
  0x26   : > { %s548_s28 = sshll.u32 %s541_s27, 4  ;;  %p4053_p8 = pneg %p4039_p6  ;;  %s4045_s28 = int_to_ptr.vmem [resolvable:$true] %s548_s28 }
  0x28   : > { %s4037_s1 = scalar_lea.hbm %s4790_s4, %s4754_s17  ;;  %s3680_s19 = scalar_lea.hbm %s4790_s4, 12288 }
  0x29   : > { %s3675_s23 = scalar_lea.hbm %s4037_s1, 6144  ;;  %p3681_p11 = scmp.lt.u32.totalorder %s4037_s1, %s4790_s4 }
  0x2a   : > { %p3676_p7 = scmp.ne.s32.totalorder %s4037_s1, %s3675_s23  ;;  %p3682_p12 = scmp.lt.u32.totalorder %s3680_s19, %s3675_s23 }
  0x2b   : > { %s4792_s16 = scalar_select %p4053_p8, 1, 0 }
  0x2c   : > { %p3678_p9 = pnand %p4053_p8, %p3676_p7  ;;  %p3683_p13 = por %p3682_p12, %p3681_p11 }
  0x2d   : > { %p3684_p0 = scmp.lt.u32.totalorder %s3675_s23, %s4037_s1 }
  0x2e   : > { %p3679_p10 = pneg %p3678_p9 }
  0x2f   : > { %p3685_p1 = por %p3684_p0, %p3683_p13 }
  0x31   : > { %p3686_p2 = pnand %p3685_p1, %p3679_p10 }
  0x33   : > { %3689 = shalt.err (!%p3686_p2)
}
  0x34   : > { %s3690_s30 = scalar_lea.vmem %s4045_s28, 6144  ;;  %s3883_s17 = smov [#allocation6]  }
  0x35   : > { %p3691_p3 = scmp.ne.s32.totalorder %s4045_s28, %s3690_s30  ;;  %s3695_s20 = sshll.u32 %s3883_s17, 4  ;;  %s3696_s20 = int_to_ptr.vmem [resolvable:$false] %s3695_s20 }
  0x36   : > { %s3697_s2 = scalar_lea.vmem %s3696_s20, 12288  ;;  %p3698_p7 = scmp.lt.s32.totalorder %s4045_s28, %s3696_s20 }
  0x37   : > { %p3693_p4 = pnand %p3691_p3, %p4053_p8  ;;  %p3699_p9 = scmp.lt.s32.totalorder %s3697_s2, %s3690_s30 }
  0x39   : > { %p3694_p5 = pneg %p3693_p4  ;;  %p3700_p11 = por %p3699_p9, %p3698_p7 }
  0x3b   : > { %p3701_p12 = pnand %p3700_p11, %p3694_p5 }
  0x3d   : > { %3704 = shalt.err (!%p3701_p12)
}
  0x3e   : > { %s3884_s23 = smov 384   ;;  %s3885_s19 = smov 24  }
  0x3f   : > { %3533 = dma.hbm_to_vmem [thread:$0]  (!%p4039_p6), %s4037_s1, 6144, %s4045_s28, %s4047_s18, %s3884_s23, %s3884_s23, %s3885_s19  }
  0x40   : > { %s4078_s27 = sadd.s32 4294967295, %s3881_s26   ;;  %p165_p10 = scmp.ne.s32.totalorder %s3865_s22, %s3861_s21 }
  0x41   : > { %p4759_p13 = scmp.eq.s32.totalorder %s4078_s27, 0  ;;  %p2900_p0 = scmp.ge.s32.totalorder %s3881_s26, 1 }
  0x42   : > { %p488_p1 = scmp.lt.s32.totalorder %s3881_s26, 3  ;;  %s3886_s1 = smov [#allocation3]  }
  0x43   : > { %p4087_p2 = por %p4759_p13, %p165_p10  ;;  %s503_s28 = sshll.u32 %s3886_s1, 4  ;;  %s504_s28 = int_to_ptr.vmem [resolvable:$true] %s503_s28 }
  0x44   : > { %p4091_p3 = pnand %p2900_p0, %p488_p1  ;;  %s4796_s20 = smul.u32 6144, %s3877_s25 }
  0x45   : > { %s4793_s30 = scalar_select %p4087_p2, 1, 0 }
  0x46   : > { %s4794_s17 = scalar_select %p4091_p3, 1, 0 }
  0x47   : > { %p3526_p4 = pneg %p4091_p3  ;;  %s4797_s10 = sld [smem:[#allocation30_spill]] }
  0x48   : > { %s4798_s4 = smul.u32 384, %s4025_s0  ;;  %s4799_s14 = sld [smem:[#allocation22_spill]] }
  0x49   : > { %p4099_p5 = pnand %p3526_p4, %p4759_p13 }
  0x4a   : > { %s595_s26 = scalar_lea.vmem [#allocation8], %s4798_s4 }
  0x4b   : > { %s602_s3 = sshll.u32 %s595_s26, 4  ;;  %p3707_p9 = pneg %p4099_p5  ;;  %s4112_s3 = int_to_ptr.vmem [resolvable:$true] %s602_s3 }
  0x4d   : > { %s4108_s19 = scalar_lea.hbm %s4797_s10, %s4796_s20 }
  0x4e   : > { %s3705_s13 = scalar_lea.hbm %s4799_s14, 512 }
  0x4f   : > { %p3706_p7 = scmp.ne.s32.totalorder %s4799_s14, %s3705_s13  ;;  %p3712_p10 = scmp.lt.u32.totalorder %s3705_s13, %s4799_s14 }
  0x51   : > { %p3708_p11 = pnand %p3707_p9, %p3706_p7 }
  0x53   : > { %p3709_p12 = pneg %p3708_p11 }
  0x55   : > { %p3714_p0 = pnand %p3712_p10, %p3709_p12 }
  0x57   : > { %3717 = shalt.err (!%p3714_p0)
}
  0x58   : > { %s3718_s4 = scalar_lea.vmem %s504_s28, 512  ;;  %p3726_p2 = scmp.lt.s32.totalorder %s504_s28, %s504_s28 }
  0x59   : > { %p3719_p1 = scmp.ne.s32.totalorder %s504_s28, %s3718_s4  ;;  %p3727_p3 = scmp.lt.s32.totalorder %s3718_s4, %s3718_s4 }
  0x5b   : > { %p3721_p4 = pnand %p3719_p1, %p3707_p9  ;;  %p3728_p6 = por %p3727_p3, %p3726_p2 }
  0x5d   : > { %p3722_p13 = pneg %p3721_p4 }
  0x5f   : > { %p3729_p8 = pnand %p3728_p6, %p3722_p13 }
  0x61   : > { %3732 = shalt.err (!%p3729_p8)
}
  0x62   : > { %s3887_s9 = smov 128   ;;  %s3888_s11 = smov 8  }
  0x63   : > { %3529 = dma.hbm_to_vmem [thread:$0]  (!%p4099_p5), %s4799_s14, 512, %s504_s28, [#allocation4], %s3887_s9, %s3887_s9, %s3888_s11  }
  0x64   : > { %s3733_s26 = scalar_lea.hbm %s4108_s19, 6144  ;;  %p4800_p6 = scmp.ne.s32.totalorder %s4792_s16, 0 }
  0x65   : > { %p3734_p2 = scmp.ne.s32.totalorder %s4108_s19, %s3733_s26  ;;  %s3738_s2 = scalar_lea.hbm %s4797_s10, 12288 }
  0x66   : > { %p3739_p3 = scmp.lt.u32.totalorder %s4108_s19, %s4797_s10  ;;  %p3740_p7 = scmp.lt.u32.totalorder %s3738_s2, %s3733_s26 }
  0x67   : > { %p3736_p8 = pnand %p3734_p2, %p4800_p6  ;;  %p3742_p11 = scmp.lt.u32.totalorder %s3733_s26, %s4108_s19 }
  0x68   : > { %p3741_p9 = por %p3740_p7, %p3739_p3 }
  0x69   : > { %p3737_p13 = pneg %p3736_p8 }
  0x6a   : > { %p3743_p12 = por %p3742_p11, %p3741_p9 }
  0x6c   : > { %p3744_p10 = pnand %p3743_p12, %p3737_p13 }
  0x6e   : > { %3747 = shalt.err (!%p3744_p10)
}
  0x6f   : > { %s3748_s28 = scalar_lea.vmem %s4112_s3, 6144  ;;  %s3889_s21 = smov [#allocation8]  }
  0x70   : > { %p3749_p5 = scmp.ne.s32.totalorder %s4112_s3, %s3748_s28  ;;  %s3753_s13 = sshll.u32 %s3889_s21, 4  ;;  %s3754_s13 = int_to_ptr.vmem [resolvable:$false] %s3753_s13 }
  0x71   : > { %s3755_s15 = scalar_lea.vmem %s3754_s13, 12288  ;;  %p3756_p4 = scmp.lt.s32.totalorder %s4112_s3, %s3754_s13 }
  0x72   : > { %p3751_p0 = pnand %p3749_p5, %p4800_p6  ;;  %p3757_p2 = scmp.lt.s32.totalorder %s3755_s15, %s3748_s28 }
  0x74   : > { %p3752_p1 = pneg %p3751_p0  ;;  %p3758_p8 = por %p3757_p2, %p3756_p4 }
  0x76   : > { %p3759_p3 = pnand %p3758_p8, %p3752_p1 }
  0x78   : > { %3762 = shalt.err (!%p3759_p3)
}
  0x79   : > { %p4801_p13 = scmp.ne.s32.totalorder %s4791_s29, 0  ;;  %s2907_s26 = sshll.u32 %s4025_s0, 7 }
  0x7a   : > { %s2968_s23 = sshll.u32 %s3877_s25, 11  ;;  %s4802_s12 = sld [smem:[#allocation32_spill]] }
  0x7b   : > { %3536 = dma.hbm_to_vmem [thread:$0]  (!%p4801_p13), %s4108_s19, 6144, %s4112_s3, %s4047_s18, %s3887_s9, %s3887_s9, %s3888_s11  }
  0x7c   : > { %s622_s4 = scalar_lea.vmem [#allocation9], %s2907_s26  ;;  %s619_s21 = scalar_lea.sflag [#allocation10], %s4025_s0 }
  0x7d   : > { %s629_s28 = sshll.u32 %s622_s4, 4  ;;  %s4165_s28 = int_to_ptr.vmem [resolvable:$true] %s629_s28 }
  0x80   : > { %s4163_s20 = scalar_lea.hbm %s4802_s12, %s2968_s23  ;;  %s3768_s19 = scalar_lea.hbm %s4802_s12, 4096 }
  0x81   : > { %s3763_s13 = scalar_lea.hbm %s4163_s20, 2048  ;;  %p3769_p12 = scmp.lt.u32.totalorder %s4163_s20, %s4802_s12 }
  0x82   : > { %p3764_p7 = scmp.ne.s32.totalorder %s4163_s20, %s3763_s13  ;;  %p3770_p10 = scmp.lt.u32.totalorder %s3768_s19, %s3763_s13 }
  0x83   : > { %p3772_p0 = scmp.lt.u32.totalorder %s3763_s13, %s4163_s20 }
  0x84   : > { %p3766_p9 = pnand %p3764_p7, %p4800_p6  ;;  %p3771_p5 = por %p3770_p10, %p3769_p12 }
  0x86   : > { %p3767_p11 = pneg %p3766_p9  ;;  %p3773_p1 = por %p3772_p0, %p3771_p5 }
  0x88   : > { %p3774_p4 = pnand %p3773_p1, %p3767_p11 }
  0x8a   : > { %3777 = shalt.err (!%p3774_p4)
}
  0x8b   : > { %s3778_s26 = scalar_lea.vmem %s4165_s28, 2048  ;;  %s3890_s1 = smov [#allocation9]  }
  0x8c   : > { %p3779_p2 = scmp.ne.s32.totalorder %s4165_s28, %s3778_s26  ;;  %s3783_s2 = sshll.u32 %s3890_s1, 4  ;;  %s3784_s2 = int_to_ptr.vmem [resolvable:$false] %s3783_s2 }
  0x8d   : > { %s3785_s4 = scalar_lea.vmem %s3784_s2, 4096  ;;  %p3786_p7 = scmp.lt.s32.totalorder %s4165_s28, %s3784_s2 }
  0x8e   : > { %p3781_p8 = pnand %p3779_p2, %p4800_p6  ;;  %p3787_p9 = scmp.lt.s32.totalorder %s3785_s4, %s3778_s26 }
  0x90   : > { %p3782_p3 = pneg %p3781_p8  ;;  %p3788_p12 = por %p3787_p9, %p3786_p7 }
  0x92   : > { %p3789_p10 = pnand %p3788_p12, %p3782_p3 }
  0x94   : > { %3792 = shalt.err (!%p3789_p10)
}
  0x95   : > { %3539 = dma.hbm_to_vmem [thread:$0]  (!%p4801_p13), %s4163_s20, 2048, %s4165_s28, %s619_s21, %s3887_s9, %s3887_s9, %s3888_s11  }
  0x96   : > { %p4803_p6 = scmp.ne.s32.totalorder %s4794_s17, 0 }
  0x97   : > { %p4804_p11 = scmp.eq.s32.totalorder (!%p4803_p6), %s4078_s27, 0 }
  0x98   : > { %659 = sbr.rel (%p4803_p6) target bundleno = 2994 (0xbb2), region = 84 }
  0x9f   : > { %3844 = dma.done.wait (%p4804_p11), [#allocation4], 512   ;;  %p4805_p5 = pmov %p4804_p11 }
  0xa0   : > { %s665_s29 = sand.u32 1, %s4078_s27   ;;  %s667_s16 = sand.u32 1, %s3865_s22  }
  0xa1   : > { %3846 = vsyncadd (%p4805_p5), [#allocation4], 4294966784  ;;  %s3510_s13 = smul.u32 384, %s667_s16  ;;  %s666_s3 = scalar_lea.sflag [#allocation7], %s665_s29 }
  0xa2   : > { %p4806_p0 = scmp.ne.s32.totalorder %s4793_s30, 0 }
  0xa3   : > { %s4202_s0 = scalar_lea.vmem [#allocation6], %s3510_s13 }
  0xa4   : > { %3848 = dma.done.wait (%p4806_p0), %s666_s3, 12288  }
  0xa5   : > { %3850 = vsyncadd (%p4806_p0), %s666_s3, 4294955008  ;;  %s2912_s17 = sshll.u32 %s667_s16, 7  ;;  %s4208_s9 = scalar_lea.vmem [#allocation8], %s3510_s13 }
  0xa6   : > { %s684_s11 = scalar_lea.sflag [#allocation10], %s667_s16  ;;  %s4210_s20 = scalar_lea.vmem [#allocation9], %s2912_s17 }
  0xa7   : > { %3852 = dma.done.wait (%p4806_p0), %s684_s11, 2048  }
  0xa8   : > { %3854 = vsyncadd (%p4806_p0), %s684_s11, 4294965248  ;;  %p792_p13 = scmp.lt.s32.totalorder %s3873_s24, 1  ;;  %s4807_s6 = sld [smem:[#allocation28_spill]] }
  0xa9   : > { %s4808_s5 = sld [smem:[#allocation27_spill]]  ;;  %s4809_s10 = sld [smem:[#allocation29_spill]] }
  0xaa   : > { %s4218_s28 = scalar_select %p792_p13, %s3873_s24, 1 }
  0xab   : > { %s4810_s15 = sld [smem:[#allocation31_spill]]  ;;  %s4811_s26 = sld [smem:[#allocation33_spill]] }
  0xac   : > { %s3511_s21 = smul.u32 3, %s4218_s28  ;;  %s2969_s18 = sshll.u32 %s4218_s28, 5 }
  0xad   : > { %s806_s3 = scalar_lea.vmem %s4740_s8, %s4218_s28  ;;  %s4813_s16 = sld [smem:[#allocation35_spill]] }
  0xae   : > { %s4225_s30 = scalar_lea.vmem %s4807_s6, %s2969_s18  ;;  %p2915_p1 = scmp.ne.s32.totalorder %s3873_s24, 0 }
  0xaf   : > { %s4234_s29 = scalar_lea.vmem %s4808_s5, %s3511_s21  ;;  %s809_s12 = scalar_lea.vmem %s4809_s10, %s4218_s28  ;;  %v827_v0 = vld [vmem:[#allocation3] sm:$0xff] (!%p2915_p1)  ;;  %v828_v1 = vld [vmem:[#allocation3 + $0x8] sm:$0xff] (!%p2915_p1)  ;;  %v829_v2 = vld [vmem:[#allocation3 + $0x10] sm:$0xff] (!%p2915_p1) }
  0xb0   : > { %s4812_s21 = sld [smem:[#allocation34_spill]]  ;;  %826 = sbr.rel (%p2915_p1) target bundleno = 183 (0xb7), region = 104  ;;  %831 = vst [vmem:[#allocation2] sm:$0xff] (!%p2915_p1), %v827_v0  ;;  %832 = vst [vmem:[#allocation2 + $0x8] sm:$0xff] (!%p2915_p1), %v828_v1  ;;  %v830_v3 = vld [vmem:[#allocation3 + $0x18] sm:$0xff] (!%p2915_p1) }
  0xb1   : > { %s812_s6 = scalar_lea.vmem %s4810_s15, %s4218_s28  ;;  %s815_s1 = scalar_lea.vmem %s4811_s26, %s4218_s28  ;;  %833 = vst [vmem:[#allocation2 + $0x10] sm:$0xff] (!%p2915_p1), %v829_v2  ;;  %834 = vst [vmem:[#allocation2 + $0x18] sm:$0xff] (!%p2915_p1), %v830_v3 }
  0xb3   : > { %s821_s13 = scalar_lea.vmem %s4813_s16, %s4218_s28 }
  0xb6   : > { %s818_s4 = scalar_lea.vmem %s4812_s21, %s4218_s28 }
  0xb7 PF: > { %v853_v4 = vld [vmem:[%s4202_s0 + $0x8] sm:$0xff]  ;;  %v856_v5 = vld [vmem:[%s4202_s0 + $0x20] sm:$0xff]  ;;  %v855_v8 = vld [vmem:[%s4202_s0 + $0x18] sm:$0xff]  ;;  %v3891_v11 = vmov 0.0   ;;  %vm1098_vm0 = vcmask 130048   ;;  %s3892_s5 = smov 112   ;;  %s4818_s19 = scalar_lea.vmem %s4739_s7, %s4218_s28 }
  0xb8   : > { %v852_v6 = vld [vmem:[%s4202_s0] sm:$0xff]  ;;  %v3298_v7 = vpack.c.bf16 %v856_v5, %v853_v4  ;;  %v859_v9 = vld [vmem:[%s4202_s0 + $0x38] sm:$0xff]  ;;  %v862_v10 = vld [vmem:[%s4202_s0 + $0x50] sm:$0xff]  ;;  %981 = vmatprep.mubr.f32.mxu0 %v3891_v11  ;;  %s4816_s22 = sld [smem:[#allocation25_spill]]  ;;  %s3893_s17 = smov 16   ;;  %vm1922_vm2 = vcmask 261120  }
  0xb9   : > { %v3300_v12 = vpack.c.bf16 %v855_v8, %v852_v6  ;;  %v3302_v13 = vpack.c.bf16 %v862_v10, %v859_v9  ;;  %v858_v14 = vld [vmem:[%s4202_s0 + $0x30] sm:$0xff]  ;;  %v861_v15 = vld [vmem:[%s4202_s0 + $0x48] sm:$0xff]  ;;  %v868_v17 = vld [vmem:[%s4202_s0 + $0x80] sm:$0xff]  ;;  %s4819_s23 = sld [smem:[#allocation24_spill]]  ;;  %p2963_p4 = scmp.ne.s32.totalorder %s3873_s24, 1 }
  0xba   : > { %v865_v16 = vld [vmem:[%s4202_s0 + $0x68] sm:$0xff]  ;;  %3299 = vmatprep.subr.bf16.mxu0 %v3298_v7  ;;  %v3304_v18 = vpack.c.bf16 %v861_v15, %v858_v14  ;;  %v864_v20 = vld [vmem:[%s4202_s0 + $0x60] sm:$0xff]  ;;  %v867_v21 = vld [vmem:[%s4202_s0 + $0x78] sm:$0xff] }
  0xbb   : > { %3301 = vmatpush1.bf16.msra.mxu0 %v3300_v12  ;;  %v3306_v19 = vpack.c.bf16 %v868_v17, %v865_v16  ;;  %v871_v22 = vld [vmem:[%s4202_s0 + $0x98] sm:$0xff]  ;;  %v874_v23 = vld [vmem:[%s4202_s0 + $0xb0] sm:$0xff]  ;;  %v3308_v24 = vpack.c.bf16 %v867_v21, %v864_v20  ;;  %v873_v27 = vld [vmem:[%s4202_s0 + $0xa8] sm:$0xff] }
  0xbc   : > { %3303 = vmatprep.subr.bf16.mxu0 %v3302_v13  ;;  %v3310_v25 = vpack.c.bf16 %v874_v23, %v871_v22  ;;  %v870_v26 = vld [vmem:[%s4202_s0 + $0x90] sm:$0xff]  ;;  %v877_v28 = vld [vmem:[%s4202_s0 + $0xc8] sm:$0xff]  ;;  %v880_v29 = vld [vmem:[%s4202_s0 + $0xe0] sm:$0xff] }
  0xbd   : > { %v4280_v30 = vld [vmem:[#allocation2] sm:$0xff]  ;;  %v854_v31 = vld [vmem:[%s4202_s0 + $0x10] sm:$0xff]  ;;  %v857_v32 = vld [vmem:[%s4202_s0 + $0x28] sm:$0xff]  ;;  %v3312_v33 = vpack.c.bf16 %v873_v27, %v870_v26  ;;  %v3314_v38 = vpack.c.bf16 %v880_v29, %v877_v28 }
  0xbe   : > { %3146 = vmatprep.mubr.f32.mxu1 %v4280_v30  ;;  %v876_v34 = vld [vmem:[%s4202_s0 + $0xc0] sm:$0xff]  ;;  %v3330_v35 = vpack.c.bf16 %v857_v32, %v854_v31  ;;  %v863_v37 = vld [vmem:[%s4202_s0 + $0x58] sm:$0xff]  ;;  %v866_v41 = vld [vmem:[%s4202_s0 + $0x70] sm:$0xff] }
  0xbf   : > { %3305 = vmatpush1.bf16.msra.mxu0 %v3304_v18  ;;  %v860_v36 = vld [vmem:[%s4202_s0 + $0x40] sm:$0xff]  ;;  %v879_v39 = vld [vmem:[%s4202_s0 + $0xd8] sm:$0xff]  ;;  %v869_v42 = vld [vmem:[%s4202_s0 + $0x88] sm:$0xff]  ;;  %v847_v18 = vlaneseq  ;;  %s4820_s2 = smov %s4819_s23 }
  0xc0   : > { %3307 = vmatprep.subr.bf16.mxu0 %v3306_v19  ;;  %v3334_v40 = vpack.c.bf16 %v863_v37, %v860_v36  ;;  %v883_v43 = vld [vmem:[%s4202_s0 + $0xf8] sm:$0xff]  ;;  %v886_v44 = vld [vmem:[%s4202_s0 + $0x110] sm:$0xff]  ;;  %3331 = vmatprep.subr.bf16.mxu1 %v3330_v35  ;;  %v3316_v45 = vpack.c.bf16 %v879_v39, %v876_v34  ;;  %v3338_v47 = vpack.c.bf16 %v869_v42, %v866_v41  ;;  %v885_v49 = vld [vmem:[%s4202_s0 + $0x108] sm:$0xff] }
  0xc1   : > { %3333 = vmatpush3.bf16.msra.mxu1 %v3330_v35  ;;  %v882_v46 = vld [vmem:[%s4202_s0 + $0xf0] sm:$0xff]  ;;  %v3318_v48 = vpack.c.bf16 %v886_v44, %v883_v43  ;;  %v872_v50 = vld [vmem:[%s4202_s0 + $0xa0] sm:$0xff]  ;;  %v875_v51 = vld [vmem:[%s4202_s0 + $0xb8] sm:$0xff]  ;;  %v903_v19 = vshrl.u32 %v847_v18, 7 }
  0xc2   : > { %3335 = vmatprep.subr.bf16.mxu1 %v3334_v40  ;;  %v889_v52 = vld [vmem:[%s4202_s0 + $0x128] sm:$0xff]  ;;  %v892_v53 = vld [vmem:[%s4202_s0 + $0x140] sm:$0xff]  ;;  %v3320_v54 = vpack.c.bf16 %v885_v49, %v882_v46  ;;  %v3342_v56 = vpack.c.bf16 %v875_v51, %v872_v50  ;;  %v891_v58 = vld [vmem:[%s4202_s0 + $0x138] sm:$0xff] }
  0xc3   : > { %3309 = vmatpush1.bf16.msra.mxu0 %v3308_v24  ;;  %v888_v55 = vld [vmem:[%s4202_s0 + $0x120] sm:$0xff]  ;;  %v3322_v57 = vpack.c.bf16 %v892_v53, %v889_v52  ;;  %v878_v59 = vld [vmem:[%s4202_s0 + $0xd0] sm:$0xff]  ;;  %v881_v60 = vld [vmem:[%s4202_s0 + $0xe8] sm:$0xff]  ;;  %v904_v20 = vsub.s32 0, %v903_v19  ;;  %v908_v23 = vsub.s32 1, %v903_v19  ;;  %v912_v37 = vsub.s32 2, %v903_v19 }
  0xc4   : > { %3311 = vmatprep.subr.bf16.mxu0 %v3310_v25  ;;  %v895_v61 = vld [vmem:[%s4202_s0 + $0x158] sm:$0xff]  ;;  %v898_v62 = vld [vmem:[%s4202_s0 + $0x170] sm:$0xff]  ;;  %v3324_v63 = vpack.c.bf16 %v891_v58, %v888_v55  ;;  %v3346_v1 = vpack.c.bf16 %v881_v60, %v878_v59  ;;  %v897_v3 = vld [vmem:[%s4202_s0 + $0x168] sm:$0xff] }
  0xc5   : > { %3337 = vmatpush3.bf16.msra.mxu1 %v3334_v40  ;;  %v894_v0 = vld [vmem:[%s4202_s0 + $0x150] sm:$0xff]  ;;  %v3326_v2 = vpack.c.bf16 %v898_v62, %v895_v61  ;;  %v884_v4 = vld [vmem:[%s4202_s0 + $0x100] sm:$0xff]  ;;  %v887_v5 = vld [vmem:[%s4202_s0 + $0x118] sm:$0xff] }
  0xc6   : > { %3339 = vmatprep.subr.bf16.mxu1 %v3338_v47  ;;  %v3328_v6 = vpack.c.bf16 %v897_v3, %v894_v0  ;;  %v3350_v7 = vpack.c.bf16 %v887_v5, %v884_v4  ;;  %v890_v8 = vld [vmem:[%s4202_s0 + $0x130] sm:$0xff]  ;;  %v893_v9 = vld [vmem:[%s4202_s0 + $0x148] sm:$0xff]  ;;  %v896_v12 = vld [vmem:[%s4202_s0 + $0x160] sm:$0xff] }
  0xc7   : > { %3313 = vmatpush1.bf16.msra.mxu0 %v3312_v33  ;;  %v3354_v10 = vpack.c.bf16 %v893_v9, %v890_v8  ;;  %v899_v13 = vld [vmem:[%s4202_s0 + $0x178] sm:$0xff]  ;;  %v4315_v14 = vld [vmem:[#allocation2 + $0x8] sm:$0xff]  ;;  %v4320_v16 = vld [vmem:[#allocation2 + $0x10] sm:$0xff]  ;;  %s4817_s0 = smov %s4816_s22 }
  0xc8   : > { %3315 = vmatprep.subr.bf16.mxu0 %v3314_v38  ;;  %v3358_v15 = vpack.c.bf16 %v899_v13, %v896_v12  ;;  %v4323_v17 = vld [vmem:[#allocation2 + $0x18] sm:$0xff]  ;;  %v900_v21 = vld [vmem:[%s4234_s29] sm:$0x7]  ;;  %vm4339_vm1 = vmpackc.low %vm1098_vm0, %vm1098_vm0 }
  0xc9   : > { %3341 = vmatpush3.bf16.msra.mxu1 %v3338_v47  ;;  %v4331_v22 = vrot.slane %v900_v21, %v904_v20  ;;  %v909_v27 = vrot.slane %v900_v21, %v908_v23  ;;  %v913_v38 = vrot.slane %v900_v21, %v912_v37  ;;  %v2917_v3 = vld [vmem:[%s4816_s22] ss:$0 sm:$0xff]  ;;  %s4821_s22 = sld [smem:[#allocation23_spill]] }
  0xca   : > { %3343 = vmatprep.subr.bf16.mxu1 %v3342_v56 }
  0xcb   : > { %3317 = vmatpush1.bf16.msra.mxu0 %v3316_v45 }
  0xcc   : > { %3319 = vmatprep.subr.bf16.mxu0 %v3318_v48 }
  0xcd   : > { %3345 = vmatpush3.bf16.msra.mxu1 %v3342_v56 }
  0xce   : > { %3347 = vmatprep.subr.bf16.mxu1 %v3346_v1 }
  0xcf   : > { %3321 = vmatpush1.bf16.msra.mxu0 %v3320_v54  ;;  %s4822_s29 = smov %s4821_s22 }
  0xd0   : > { %3323 = vmatprep.subr.bf16.mxu0 %v3322_v57 }
  0xd1   : > { %3349 = vmatpush3.bf16.msra.mxu1 %v3346_v1 }
  0xd2   : > { %3351 = vmatprep.subr.bf16.mxu1 %v3350_v7 }
  0xd3   : > { %3325 = vmatpush1.bf16.msra.mxu0 %v3324_v63 }
  0xd4   : > { %3327 = vmatprep.subr.bf16.mxu0 %v3326_v2 }
  0xd5   : > { %3353 = vmatpush3.bf16.msra.mxu1 %v3350_v7 }
  0xd6   : > { %3355 = vmatprep.subr.bf16.mxu1 %v3354_v10 }
  0xd7   : > { %3329 = vmatpush1.bf16.msra.mxu0 %v3328_v6 }
  0xd9   : > { %3357 = vmatpush3.bf16.msra.mxu1 %v3354_v10 }
  0xda   : > { %982 = vmatmul.mubr.f32.vlgmr.msra.gmra.mrb[0].mxu0 %v4280_v30  ;;  %3359 = vmatprep.subr.bf16.mxu1 %v3358_v15 }
  0xdb   : > { %987 = vmatprep.mubr.f32.mxu0 %v3891_v11 }
  0xdd   : > { %3361 = vmatpush3.bf16.msra.mxu1 %v3358_v15 }
  0xde   : > { %988 = vmatmul.mubr.f32.gmra.mrb[2].mxu0 %v4315_v14 }
  0xdf   : > { %993 = vmatprep.mubr.f32.mxu0 %v3891_v11 }
  0xe0   : > { %3147 = vmatmul.mubr.f32.vlgmr.msra.gmra.mrb[0].mxu1 %v4315_v14 }
  0xe1   : > { %3149 = vmatprep.mubr.f32.mxu1 %v4320_v16 }
  0xe2   : > { %994 = vmatmul.mubr.f32.gmra.mrb[4].mxu0 %v4320_v16 }
  0xe3   : > { %999 = vmatprep.mubr.f32.mxu0 %v3891_v11 }
  0xe4   : > { %3150 = vmatmul.mubr.f32.gmra.mrb[2].mxu1 %v4323_v17 }
  0xe6   : > { %1000 = vmatmul.mubr.f32.gmra.mrb[6].mxu0 %v4323_v17 }
 0x1ad   : > { %v983_v24 = vpop.f32.mrb[0].mxu0 }
 0x1ae   : > { %v984_v25 = vadd.f32 %v983_v24, %v4331_v22  ;;  %v985_v26 = vpop.f32.mrb[1].mxu0 }
 0x1af   : > { %v986_v32 = vadd.f32 %v985_v26, %v909_v27 }
 0x1b0   : > { %3156 = vmatprep.mubr.msk.f32.mxu1 %vm1098_vm0, %v984_v25 }
 0x1b1   : > { %v989_v28 = vpop.f32.mrb[2].mxu0 }
 0x1b2   : > { %v990_v29 = vadd.f32 %v989_v28, %v4331_v22  ;;  %v991_v31 = vpop.f32.mrb[3].mxu0 }
 0x1b3   : > { %v992_v33 = vadd.f32 %v991_v31, %v909_v27  ;;  %v3148_v39 = vpop.f32.mrb[0].mxu1 }
 0x1b4   : > { %1291 = vrot.lane.b32.xlu1 %v990_v29, %s3892_s5  ;;  %v1072_v40 = vpop.f32.mrb[1].mxu1  ;;  %v1078_v41 = vadd.f32 %v3148_v39, %v913_v38 }
 0x1b5   : > { %v3362_v35 = vpack.c.bf16 %v992_v33, %v986_v32  ;;  %v3605_v36 = vpack.i.bf16 %v992_v33, %v986_v32  ;;  %v1073_v42 = vadd.f32 %v1072_v40, %v913_v38  ;;  %v995_v51 = vpop.f32.mrb[4].mxu0 }
 0x1b6   : > { %v997_v52 = vpop.f32.mrb[5].mxu0  ;;  %v996_v10 = vadd.f32 %v995_v51, %v4331_v22 }
 0x1b7   : > { %3606 = vrot.lane.b32.xlu0 %v3605_v36, %s3892_s5  ;;  %3364 = vmatprep.subr.msk.bf16.mxu1 %vm4339_vm1, %v3362_v35  ;;  %v3610_v43 = vpack.i.bf16 %v1078_v41, %v1073_v42  ;;  %v3368_v44 = vpack.c.bf16 %v1078_v41, %v1073_v42  ;;  %v3151_v45 = vpop.f32.mrb[2].mxu1  ;;  %v998_v53 = vadd.f32 %v997_v52, %v909_v27  ;;  %v2931_v41 = vld [vmem:[%s4817_s0 + $0x1] ss:$0 sm:$0xff] }
 0x1b8   : > { %3367 = vmatpush3.bf16.xpose.msk.msra.mxu1 %vm4339_vm1, %v3362_v35  ;;  %v4350_v46 = vadd.f32 %v3151_v45, %v913_v38  ;;  %v1082_v47 = vpop.f32.mrb[3].mxu1 }
 0x1b9   : > { %3369 = vmatprep.subr.bf16.mxu1 %v3368_v44  ;;  %v4352_v48 = vadd.f32 %v1082_v47, %v913_v38  ;;  %v1001_v54 = vpop.f32.mrb[6].mxu0 }
 0x1ba   : > { %v1003_v55 = vpop.f32.mrb[7].mxu0  ;;  %v1002_v12 = vadd.f32 %v1001_v54, %v4331_v22 }
 0x1bb   : > { %1289 = vrot.lane.b32.xlu0 %v984_v25, %s3892_s5  ;;  %v3620_v49 = vpack.i.bf16 %v4350_v46, %v4352_v48  ;;  %v4358_v50 = vpack.c.bf16 %v4350_v46, %v4352_v48  ;;  %v1004_v56 = vadd.f32 %v1003_v55, %v909_v27 }
 0x1bd   : > { %v3615_v57 = vpack.i.bf16 %v1004_v56, %v998_v53  ;;  %v3382_v58 = vpack.c.bf16 %v1004_v56, %v998_v53 }
 0x1bf   : > { %3157 = vmatmul.mubr.msk.f32.vlgmr.msra.gmra.mrb[4].mxu1 %vm1098_vm0, %v990_v29 }
 0x1c0   : > { %3371 = vmatpush3.bf16.msra.mxu1 %v3368_v44 }
 0x1c1   : > { %3389 = vmatprep.subr.bf16.mxu1 %v4358_v50 }
 0x226   : > { %v1292_v0 = vpop.permute.xlu1 %1291 }
 0x229   : > { %v3607_v59 = vpop.permute.xlu0 %3606 }
 0x22a   : > { %v3609_v60 = vunpack.i.h.bf16 %v3607_v59  ;;  %v3608_v61 = vunpack.i.l.bf16 %v3607_v59 }
 0x22c   : > { %v3372_v62 = vpack.c.bf16 %v3609_v60, %v3608_v61 }
 0x22d   : > { %v1290_v63 = vpop.permute.xlu0 %1289 }
 0x22e   : > { %3374 = vmatprep.subr.msk.bf16.mxu0 %vm4339_vm1, %v3372_v62  ;;  %3170 = vmatprep.mubr.msk.f32.mxu0 %vm1098_vm0, %v1290_v63 }
 0x22f   : > { %3377 = vmatpush3.bf16.xpose.msk.msra.mxu0 %vm4339_vm1, %v3372_v62 }
 0x236   : > { %3171 = vmatmul.mubr.msk.f32.vlgmr.msra.gmra.mrb[8].mxu0 %vm1098_vm0, %v1292_v0 }
 0x292   : > { %v4367_v1 = vpop.f32.mrb[4].mxu1 }
 0x293   : > { %v1177_v2 = vpop.f32.mrb[5].mxu1  ;;  %v1183_v52 = vadd.f32 %v4367_v1, %v2917_v3 }
 0x294   : > { %v1178_v47 = vadd.f32 %v2917_v3, %v1177_v2 }
 0x295   : > { %v1189_v55 = vsel %vm1098_vm0, %v1183_v52, -inf }
 0x296   : > { %v1186_v53 = vsel %vm1098_vm0, %v1178_v47, -inf }
 0x309   : > { %v3172_v4 = vpop.f32.mrb[8].mxu0 }
 0x30a   : > { %v1377_v5 = vadd.f32 %v3172_v4, %v2917_v3  ;;  %v1371_v6 = vpop.f32.mrb[9].mxu0 }
 0x30b   : > { %v1372_v7 = vadd.f32 %v2917_v3, %v1371_v6 }
 0x30c   : > { %v1383_v8 = vsel %vm1098_vm0, %v1377_v5, -inf }
 0x30d   : > { %1384 = vmax.xlane.f32.xlu0 %v1383_v8  ;;  %v1380_v9 = vsel %vm1098_vm0, %v1372_v7, -inf }
 0x30e   : > { %1381 = vmax.xlane.f32.xlu1 %v1380_v9 }
 0x31f   : > { %3616 = vrot.lane.b32.xlu1 %v3615_v57, %s3892_s5 }
 0x323   : > { %3611 = vrot.lane.b32.xlu0 %v3610_v43, %s3892_s5  ;;  %1699 = vrot.lane.b32.xlu1 %v996_v10, %s3892_s5 }
 0x327   : > { %1701 = vrot.lane.b32.xlu0 %v1002_v12, %s3892_s5 }
 0x39a   : > { %v1385_v13 = vpop.xlane.xlu0 %1384 }
 0x39b   : > { %v1387_v15 = vsub.f32 %v1377_v5, %v1385_v13  ;;  %v1382_v19 = vpop.xlane.xlu1 %1381 }
 0x39c   : > { %v1386_v20 = vsub.f32 %v1372_v7, %v1382_v19 }
 0x39d   : > { %v1390_v21 = vmul.f32 1.442695, %v1387_v15 }
 0x39e   : > { %v1388_v23 = vmul.f32 1.442695, %v1386_v20  ;;  %v3612_v24 = vpop.permute.xlu0 %3611 }
 0x39f   : > { %v3614_v25 = vunpack.i.h.bf16 %v3612_v24  ;;  %v3613_v26 = vunpack.i.l.bf16 %v3612_v24  ;;  %v3617_v28 = vpop.permute.xlu1 %3616 }
 0x3a0   : > { %3627 = vpow2.f32 %v1388_v23  ;;  %v3619_v22 = vunpack.i.h.bf16 %v3617_v28  ;;  %v3618_v29 = vunpack.i.l.bf16 %v3617_v28 }
 0x3a1   : > { %3629 = vpow2.f32 %v1390_v21  ;;  %v3378_v27 = vpack.c.bf16 %v3614_v25, %v3613_v26 }
 0x3a2   : > { %v3392_v33 = vpack.c.bf16 %v3619_v22, %v3618_v29  ;;  %v1702_v36 = vpop.permute.xlu0 %1701 }
 0x3a3   : > { %3379 = vmatprep.subr.bf16.mxu0 %v3378_v27  ;;  %v1700_v35 = vpop.permute.xlu1 %1699 }
 0x3a4   : > { %3381 = vmatpush3.bf16.msra.mxu0 %v3378_v27 }
 0x3a5   : > { %3384 = vmatprep.subr.msk.bf16.mxu0 %vm4339_vm1, %v3382_v58 }
 0x3aa   : > { %v3628_v31 = vpop.eup %3627 }
 0x3ab   : > { %v3630_v32 = vpop.eup %3629  ;;  %3177 = vmatprep.mubr.msk.f32.mxu0 %vm1098_vm0, %v3628_v31  ;;  %v1392_v59 = vsel %vm1098_vm0, %v3628_v31, 0.0 }
 0x3ac   : > { %3178 = vmatmul.mubr.msk.f32.vlgmr.msra.gmra.mrb[10].mxu0 %vm1098_vm0, %v3630_v32  ;;  %v1395_v60 = vsel %vm1098_vm0, %v3630_v32, 0.0 }
 0x3ad   : > { %3387 = vmatpush3.bf16.xpose.msk.msra.mxu0 %vm4339_vm1, %v3382_v58  ;;  %3184 = vmatprep.mubr.msk.f32.mxu0 %vm1098_vm0, %v996_v10 }
 0x3ae   : > { %3394 = vmatprep.subr.msk.bf16.mxu0 %vm4339_vm1, %v3392_v33 }
 0x3b4   : > { %3185 = vmatmul.mubr.msk.f32.vlgmr.msra.gmra.mrb[12].mxu0 %vm1098_vm0, %v1002_v12 }
 0x3b5   : > { %3397 = vmatpush3.bf16.xpose.msk.msra.mxu0 %vm4339_vm1, %v3392_v33  ;;  %3198 = vmatprep.mubr.msk.f32.mxu0 %vm1098_vm0, %v1700_v35 }
 0x3bc   : > { %3199 = vmatmul.mubr.msk.f32.vlgmr.msra.gmra.mrb[14].mxu0 %vm1098_vm0, %v1702_v36 }
 0x47f   : > { %v4394_v37 = vpop.f32.mrb[10].mxu0 }
 0x480   : > { %v4396_v38 = vpop.f32.mrb[11].mxu0 }
 0x487   : > { %v3186_v39 = vpop.f32.mrb[12].mxu0 }
 0x488   : > { %v1587_v40 = vpop.f32.mrb[13].mxu0  ;;  %v1593_v56 = vadd.f32 %v3186_v39, %v2931_v41 }
 0x489   : > { %v1588_v54 = vadd.f32 %v2931_v41, %v1587_v40 }
 0x48a   : > { %v1599_v58 = vsel %vm1098_vm0, %v1593_v56, -inf }
 0x48b   : > { %v1596_v57 = vsel %vm1098_vm0, %v1588_v54, -inf }
 0x48f   : > { %v3200_v42 = vpop.f32.mrb[14].mxu0 }
 0x490   : > { %v1787_v43 = vadd.f32 %v3200_v42, %v2931_v41  ;;  %v1781_v44 = vpop.f32.mrb[15].mxu0  ;;  %v1911_v42 = vld [vmem:[%s4225_s30] sm:$0xff] }
 0x491   : > { %v1782_v34 = vadd.f32 %v2931_v41, %v1781_v44 }
 0x492   : > { %v1793_v45 = vsel %vm1098_vm0, %v1787_v43, -inf }
 0x493   : > { %1794 = vmax.xlane.f32.xlu0 %v1793_v45  ;;  %v1790_v51 = vsel %vm1098_vm0, %v1782_v34, -inf  ;;  %v1914_v45 = vld [vmem:[%s4225_s30 + $0x18] sm:$0xff] }
 0x494   : > { %1791 = vmax.xlane.f32.xlu1 %v1790_v51 }
 0x498   : > { %1187 = vmax.xlane.f32.xlu1 %v1186_v53 }
 0x49c   : > { %1190 = vmax.xlane.f32.xlu1 %v1189_v55 }
 0x4a0   : > { %1597 = vmax.xlane.f32.xlu1 %v1596_v57 }
 0x4a4   : > { %1600 = vmax.xlane.f32.xlu1 %v1599_v58 }
 0x4a8   : > { %1393 = vadd.xlane.f32.xlu1 %v1392_v59 }
 0x4a9   : > { %3621 = vrot.lane.b32.xlu0 %v3620_v49, %s3892_s5 }
 0x4ac   : > { %1396 = vadd.xlane.f32.xlu1 %v1395_v60 }
 0x520   : > { %v1795_v61 = vpop.xlane.xlu0 %1794 }
 0x521   : > { %v1797_v62 = vsub.f32 %v1787_v43, %v1795_v61  ;;  %v1792_v63 = vpop.xlane.xlu1 %1791  ;;  %v1912_v43 = vld [vmem:[%s4225_s30 + $0x8] sm:$0xff] }
 0x522   : > { %v1796_v0 = vsub.f32 %v1782_v34, %v1792_v63  ;;  %v3402_v44 = vpack.c.bf16 %v1912_v43, %v1911_v42  ;;  %v1913_v34 = vld [vmem:[%s4225_s30 + $0x10] sm:$0xff]  ;;  %v2244_v42 = vld [vmem:[%s4208_s9 + $0x80] sm:$0xff]  ;;  %v2245_v43 = vld [vmem:[%s4208_s9 + $0x88] sm:$0xff] }
 0x523   : > { %v1800_v1 = vmul.f32 1.442695, %v1797_v62 }
 0x524   : > { %v1798_v2 = vmul.f32 1.442695, %v1796_v0  ;;  %v3622_v3 = vpop.permute.xlu0 %3621 }
 0x525   : > { %3631 = vpow2.f32 %v1800_v1  ;;  %v1188_v4 = vpop.xlane.xlu1 %1187  ;;  %v3624_v5 = vunpack.i.h.bf16 %v3622_v3  ;;  %v3623_v6 = vunpack.i.l.bf16 %v3622_v3 }
 0x526   : > { %3633 = vpow2.f32 %v1798_v2  ;;  %v1192_v7 = vsub.f32 %v1178_v47, %v1188_v4  ;;  %v3406_v47 = vpack.c.bf16 %v1914_v45, %v1913_v34  ;;  %v3410_v34 = vpack.c.bf16 %v2245_v43, %v2244_v42  ;;  %v2229_v45 = vld [vmem:[%s4208_s9 + $0x8] sm:$0xff]  ;;  %v2256_v43 = vld [vmem:[%s4208_s9 + $0xe0] sm:$0xff] }
 0x527   : > { %v3398_v8 = vpack.c.bf16 %v3624_v5, %v3623_v6 }
 0x528   : > { %v1194_v9 = vmul.f32 1.442695, %v1192_v7 }
 0x529   : > { %v1191_v46 = vpop.xlane.xlu1 %1190  ;;  %3399 = vmatprep.subr.bf16.mxu0 %v3398_v8 }
 0x52a   : > { %3635 = vpow2.f32 %v1194_v9  ;;  %v1193_v48 = vsub.f32 %v1183_v52, %v1191_v46  ;;  %3401 = vmatpush3.bf16.msra.mxu0 %v3398_v8 }
 0x52b   : > { %3403 = vmatprep.subr.bf16.mxu0 %v3402_v44 }
 0x52c   : > { %v1196_v49 = vmul.f32 1.442695, %v1193_v48 }
 0x52d   : > { %v1598_v10 = vpop.xlane.xlu1 %1597 }
 0x52e   : > { %3637 = vpow2.f32 %v1196_v49  ;;  %v1602_v12 = vsub.f32 %v1588_v54, %v1598_v10 }
 0x52f   : > { %v3632_v13 = vpop.eup %3631 }
 0x530   : > { %v3634_v15 = vpop.eup %3633  ;;  %v1604_v19 = vmul.f32 1.442695, %v1602_v12  ;;  %v1805_v20 = vsel %vm1098_vm0, %v3632_v13, 0.0 }
 0x531   : > { %3205 = vmatprep.mubr.msk.f32.mxu0 %vm1098_vm0, %v3634_v15  ;;  %1806 = vadd.xlane.f32.xlu1 %v1805_v20  ;;  %v1601_v21 = vpop.xlane.xlu1 %1600  ;;  %v1802_v23 = vsel %vm1098_vm0, %v3634_v15, 0.0 }
 0x532   : > { %3639 = vpow2.f32 %v1604_v19  ;;  %v1603_v24 = vsub.f32 %v1593_v56, %v1601_v21  ;;  %3206 = vmatmul.mubr.msk.f32.vlgmr.msra.gmra.mrb[16].mxu0 %vm1098_vm0, %v3632_v13  ;;  %1803 = vadd.xlane.f32.xlu0 %v1802_v23  ;;  %v2944_v19 = vld [vmem:[%s4818_s19] ss:$0 sm:$0xff] }
 0x533   : > { %3405 = vmatpush3.bf16.msra.mxu0 %v3402_v44  ;;  %v2228_v44 = vld [vmem:[%s4208_s9] sm:$0xff] }
 0x534   : > { %v3636_v25 = vpop.eup %3635  ;;  %v1606_v26 = vmul.f32 1.442695, %v1603_v24  ;;  %3407 = vmatprep.subr.bf16.mxu0 %v3406_v47 }
 0x535   : > { %3163 = vmatprep.mubr.msk.f32.mxu1 %vm1098_vm0, %v3636_v25  ;;  %v1394_v27 = vpop.xlane.xlu1 %1393  ;;  %v1198_v28 = vsel %vm1098_vm0, %v3636_v25, 0.0 }
 0x536   : > { %3641 = vpow2.f32 %v1606_v26  ;;  %1199 = vadd.xlane.f32.xlu1 %v1198_v28 }
 0x537   : > { %3409 = vmatpush3.bf16.msra.mxu0 %v3406_v47  ;;  %v2246_v47 = vld [vmem:[%s4208_s9 + $0x90] sm:$0xff] }
 0x538   : > { %v3638_v22 = vpop.eup %3637 }
 0x539   : > { %3164 = vmatmul.mubr.msk.f32.vlgmr.msra.gmra.mrb[6].mxu1 %vm1098_vm0, %v3638_v22  ;;  %v1397_v29 = vpop.xlane.xlu1 %1396  ;;  %v1201_v31 = vsel %vm1098_vm0, %v3638_v22, 0.0 }
 0x53a   : > { %3391 = vmatpush3.bf16.msra.mxu1 %v4358_v50  ;;  %3643 = vrcp.f32 %v1397_v29  ;;  %1202 = vadd.xlane.f32.xlu1 %v1201_v31 }
 0x53b   : > { %3645 = vrcp.f32 %v1394_v27  ;;  %3411 = vmatprep.subr.bf16.mxu1 %v3410_v34 }
 0x53c   : > { %v3640_v32 = vpop.eup %3639 }
 0x53d   : > { %3191 = vmatprep.mubr.msk.f32.mxu1 %vm1098_vm0, %v3640_v32  ;;  %v1608_v33 = vsel %vm1098_vm0, %v3640_v32, 0.0 }
 0x53e   : > { %1609 = vadd.xlane.f32.xlu1 %v1608_v33  ;;  %v3894_v33 = vmov 0  }
 0x53f   : > { %3626 = vset.pattern.permute.xlu1 %v3894_v33  ;;  %3625 = vset.pattern.permute.xlu0 %v3894_v33 }
 0x540   : > { %v3642_v35 = vpop.eup %3641 }
 0x541   : > { %3192 = vmatmul.mubr.msk.f32.vlgmr.msra.gmra.mrb[8].mxu1 %vm1098_vm0, %v3642_v35  ;;  %v1611_v36 = vsel %vm1098_vm0, %v3642_v35, 0.0 }
 0x542   : > { %1612 = vadd.xlane.f32.xlu1 %v1611_v36 }
 0x544   : > { %v3644_v39 = vpop.eup %3643 }
 0x545   : > { %v1490_v50 = vmul.f32 %v3644_v39, %v4394_v37  ;;  %v3646_v40 = vpop.eup %3645 }
 0x546   : > { %v1488_v41 = vmul.f32 %v3646_v40, %v4396_v38 }
 0x548   : > { %1495 = vrot.lane.b32.xlu0 %v1490_v50, %s3893_s17 }
 0x553   : > { %1493 = vrot.lane.b32.xlu1 %v1488_v41, %s3893_s17 }
 0x5be   : > { %v1807_v51 = vpop.xlane.xlu1 %1806 }
 0x5bf   : > { %v1804_v52 = vpop.xlane.xlu0 %1803 }
 0x5c0   : > { %3647 = vrcp.f32 %v1804_v52 }
 0x5c1   : > { %3649 = vrcp.f32 %v1807_v51  ;;  %v2247_v51 = vld [vmem:[%s4208_s9 + $0x98] sm:$0xff] }
 0x5c2   : > { %v3414_v52 = vpack.c.bf16 %v2247_v51, %v2246_v47  ;;  %v2241_v47 = vld [vmem:[%s4208_s9 + $0x68] sm:$0xff]  ;;  %v839_v51 = vld [vmem:[%s4822_s29] sm:$0xff] }
 0x5c3   : > { %v1200_v37 = vpop.xlane.xlu1 %1199  ;;  %v1496_v4 = vpop.permute.xlu0 %1495 }
 0x5c7   : > { %v1203_v53 = vpop.xlane.xlu1 %1202 }
 0x5c8   : > { %3651 = vrcp.f32 %v1203_v53  ;;  %v2230_v53 = vld [vmem:[%s4208_s9 + $0x10] sm:$0xff] }
 0x5c9   : > { %3653 = vrcp.f32 %v1200_v37  ;;  %v3412_v37 = vpack.c.bf16 %v2229_v45, %v2228_v44  ;;  %v2257_v44 = vld [vmem:[%s4208_s9 + $0xe8] sm:$0xff]  ;;  %v2240_v45 = vld [vmem:[%s4208_s9 + $0x60] sm:$0xff] }
 0x5ca   : > { %v3648_v55 = vpop.eup %3647  ;;  %v3434_v34 = vpack.c.bf16 %v2257_v44, %v2256_v43 }
 0x5cb   : > { %v1610_v54 = vpop.xlane.xlu1 %1609  ;;  %v3650_v59 = vpop.eup %3649  ;;  %3413 = vmatpush3.bf16.msra.mxu1 %v3412_v37 }
 0x5cc   : > { %3415 = vmatprep.subr.bf16.mxu1 %v3414_v52  ;;  %v3436_v52 = vpack.c.bf16 %v2241_v47, %v2240_v45 }
 0x5cf   : > { %v1613_v57 = vpop.xlane.xlu1 %1612 }
 0x5d0   : > { %3655 = vrcp.f32 %v1613_v57 }
 0x5d1   : > { %3657 = vrcp.f32 %v1610_v54  ;;  %v2231_v54 = vld [vmem:[%s4208_s9 + $0x18] sm:$0xff] }
 0x5d2   : > { %v3652_v61 = vpop.eup %3651 }
 0x5d3   : > { %v3654_v63 = vpop.eup %3653  ;;  %v1494_v3 = vpop.permute.xlu1 %1493 }
 0x5da   : > { %v3656_v7 = vpop.eup %3655 }
 0x5db   : > { %v3658_v9 = vpop.eup %3657 }
 0x605   : > { %v3207_v38 = vpop.f32.mrb[16].mxu0 }
 0x606   : > { %v1888_v56 = vpop.f32.mrb[17].mxu0  ;;  %v1900_v60 = vmul.f32 %v3650_v59, %v3207_v38  ;;  %v2248_v38 = vld [vmem:[%s4208_s9 + $0xa0] sm:$0xff]  ;;  %v2233_v59 = vld [vmem:[%s4208_s9 + $0x28] sm:$0xff] }
 0x607   : > { %v1898_v58 = vmul.f32 %v3648_v55, %v1888_v56  ;;  %v2249_v55 = vld [vmem:[%s4208_s9 + $0xa8] sm:$0xff]  ;;  %v3416_v56 = vpack.c.bf16 %v2231_v54, %v2230_v53  ;;  %v845_v53 = vld [vmem:[%s4820_s2 + $0x10] sm:$0xff]  ;;  %v2264_v54 = vld [vmem:[%s4208_s9 + $0x120] sm:$0xff] }
 0x608   : > { %v3418_v57 = vpack.c.bf16 %v2249_v55, %v2248_v38  ;;  %v2265_v38 = vld [vmem:[%s4208_s9 + $0x128] sm:$0xff]  ;;  %v841_v55 = vld [vmem:[%s4822_s29 + $0x10] sm:$0xff] }
 0x609   : > { %1903 = vrot.lane.b32.xlu1 %v1898_v58, %s3893_s17  ;;  %v2232_v58 = vld [vmem:[%s4208_s9 + $0x20] sm:$0xff]  ;;  %3417 = vmatpush3.bf16.msra.mxu1 %v3416_v56  ;;  %v3450_v56 = vpack.c.bf16 %v2265_v38, %v2264_v54 }
 0x60a   : > { %3419 = vmatprep.subr.bf16.mxu1 %v3418_v57  ;;  %v2258_v57 = vld [vmem:[%s4208_s9 + $0xf0] sm:$0xff] }
 0x60c   : > { %v3165_v62 = vpop.f32.mrb[6].mxu1 }
 0x60d   : > { %v1288_v0 = vmul.f32 %v3652_v61, %v3165_v62  ;;  %v1276_v1 = vpop.f32.mrb[7].mxu1  ;;  %1905 = vrot.lane.b32.xlu1 %v1900_v60, %s3893_s17  ;;  %v2250_v60 = vld [vmem:[%s4208_s9 + $0xb0] sm:$0xff]  ;;  %v2251_v61 = vld [vmem:[%s4208_s9 + $0xb8] sm:$0xff]  ;;  %v3420_v62 = vpack.c.bf16 %v2233_v59, %v2232_v58 }
 0x60e   : > { %v1286_v2 = vmul.f32 %v3654_v63, %v1276_v1  ;;  %v3422_v63 = vpack.c.bf16 %v2251_v61, %v2250_v60  ;;  %v2235_v1 = vld [vmem:[%s4208_s9 + $0x38] sm:$0xff]  ;;  %v2242_v60 = vld [vmem:[%s4208_s9 + $0x70] sm:$0xff] }
 0x60f   : > { %v1500_v6 = vsel %vm1098_vm0, %v1288_v0, %v1496_v4  ;;  %v2234_v0 = vld [vmem:[%s4208_s9 + $0x30] sm:$0xff]  ;;  %3421 = vmatpush3.bf16.msra.mxu1 %v3420_v62  ;;  %v2259_v58 = vld [vmem:[%s4208_s9 + $0xf8] sm:$0xff] }
 0x610   : > { %v1499_v5 = vsel %vm1098_vm0, %v1286_v2, %v1494_v3  ;;  %v2252_v2 = vld [vmem:[%s4208_s9 + $0xc0] sm:$0xff]  ;;  %v2253_v3 = vld [vmem:[%s4208_s9 + $0xc8] sm:$0xff]  ;;  %v3424_v4 = vpack.c.bf16 %v2235_v1, %v2234_v0  ;;  %3423 = vmatprep.subr.bf16.mxu1 %v3422_v63  ;;  %v3438_v59 = vpack.c.bf16 %v2259_v58, %v2258_v57  ;;  %v2243_v61 = vld [vmem:[%s4208_s9 + $0x78] sm:$0xff]  ;;  %v2137_v63 = vadd.s32 4294967295, %v845_v53 }
 0x611   : > { %3216 = vmatprep.mubr.msk.f32.mxu0 %vm1922_vm2, %v1499_v5  ;;  %v3426_v5 = vpack.c.bf16 %v2253_v3, %v2252_v2  ;;  %v3440_v0 = vpack.c.bf16 %v2243_v61, %v2242_v60  ;;  %v2266_v1 = vld [vmem:[%s4208_s9 + $0x130] sm:$0xff]  ;;  %v2267_v2 = vld [vmem:[%s4208_s9 + $0x138] sm:$0xff] }
 0x612   : > { %3217 = vmatmul.mubr.msk.f32.vlgmr.msra.gmra.mrb[18].mxu0 %vm1922_vm2, %v1500_v6  ;;  %v2236_v6 = vld [vmem:[%s4208_s9 + $0x40] sm:$0xff]  ;;  %vm2145_vm1 = vcmp.lt.s32.totalorder %v2137_v63, 16  ;;  %v2459_v58 = vld [vmem:[%s4210_s20 + $0x10] sm:$0xff] }
 0x613   : > { %3425 = vmatpush3.bf16.msra.mxu1 %v3424_v4  ;;  %v3454_v4 = vpack.c.bf16 %v2267_v2, %v2266_v1 }
 0x614   : > { %v3193_v8 = vpop.f32.mrb[8].mxu1  ;;  %3427 = vmatprep.subr.bf16.mxu1 %v3426_v5 }
 0x615   : > { %v1698_v46 = vmul.f32 %v3656_v7, %v3193_v8  ;;  %v1686_v48 = vpop.f32.mrb[9].mxu1  ;;  %v2237_v7 = vld [vmem:[%s4208_s9 + $0x48] sm:$0xff] }
 0x616   : > { %v1696_v49 = vmul.f32 %v3658_v9, %v1686_v48  ;;  %v3428_v8 = vpack.c.bf16 %v2237_v7, %v2236_v6  ;;  %v2268_v7 = vld [vmem:[%s4208_s9 + $0x140] sm:$0xff] }
 0x618   : > { %3429 = vmatpush3.bf16.msra.mxu1 %v3428_v8  ;;  %v2269_v8 = vld [vmem:[%s4208_s9 + $0x148] sm:$0xff] }
 0x67b   : > { %v1904_v10 = vpop.permute.xlu1 %1903 }
 0x67c   : > { %v1909_v12 = vsel %vm1098_vm0, %v1696_v49, %v1904_v10 }
 0x67d   : > { %3219 = vmatprep.mubr.msk.f32.mxu0 %vm1922_vm2, %v1909_v12 }
 0x67f   : > { %v1906_v13 = vpop.permute.xlu1 %1905 }
 0x680   : > { %v1910_v15 = vsel %vm1098_vm0, %v1698_v46, %v1906_v13  ;;  %vm2141_vm0 = vcmp.ge.s32.totalorder %v2137_v63, 0 }
 0x681   : > { %3220 = vmatmul.mubr.msk.f32.gmra.mrb[20].mxu0 %vm1922_vm2, %v1910_v15  ;;  %vm2149_vm2 = vmand %vm2141_vm0, %vm2145_vm1 }
 0x6e5   : > { %v3218_v20 = vpop.f32.mrb[18].mxu0 }
 0x6e6   : > { %v2007_v21 = vadd.f32 %v3218_v20, %v2944_v19  ;;  %v2001_v23 = vpop.f32.mrb[19].mxu0 }
 0x6e7   : > { %v2002_v24 = vadd.f32 %v2944_v19, %v2001_v23 }
 0x6e8   : > { %v2021_v25 = vadd.f32 %v2007_v21, %v4315_v14  ;;  %v4511_v21 = vld [vmem:[%s4819_s23] sm:$0xff] }
 0x6e9   : > { %v2020_v26 = vadd.f32 %v2002_v24, %v4280_v30  ;;  %v848_v30 = vand.u32 127, %v847_v18  ;;  %v2135_v23 = vadd.s32 4294967295, %v4511_v21  ;;  %v846_v24 = vld [vmem:[%s4820_s2 + $0x18] sm:$0xff]  ;;  %v2188_v6 = vadd.s32 1, %v4511_v21  ;;  %v2272_v21 = vld [vmem:[%s4208_s9 + $0x160] sm:$0xff] }
 0x6ea   : > { %2028 = vadd.xlane.f32.xlu0 %v2021_v25 }
 0x6eb   : > { %2026 = vadd.xlane.f32.xlu1 %v2020_v26  ;;  %vm849_vm3 = vcmp.lt.s32.totalorder %v848_v30, 32  ;;  %vm2139_vm4 = vcmp.ge.s32.totalorder %v2135_v23, 0  ;;  %vm2143_vm5 = vcmp.lt.s32.totalorder %v2135_v23, 16  ;;  %v2273_v23 = vld [vmem:[%s4208_s9 + $0x168] sm:$0xff] }
 0x6ec   : > { %v4464_v35 = vsel %vm849_vm3, 1.0, %v3891_v11  ;;  %vm2147_vm6 = vmand %vm2139_vm4, %vm2143_vm5  ;;  %vm2192_vm3 = vcmp.ge.s32.totalorder %v2188_v6, 0  ;;  %vm2196_vm4 = vcmp.lt.s32.totalorder %v2188_v6, 16 }
 0x6ed   : > { %vm2200_vm5 = vmand %vm2192_vm3, %vm2196_vm4 }
 0x754   : > { %v3221_v27 = vpop.f32.mrb[20].mxu0 }
 0x755   : > { %v2017_v28 = vadd.f32 %v3221_v27, %v2944_v19  ;;  %v2011_v22 = vpop.f32.mrb[21].mxu0  ;;  %v2260_v27 = vld [vmem:[%s4208_s9 + $0x100] sm:$0xff] }
 0x756   : > { %v2012_v29 = vadd.f32 %v2944_v19, %v2011_v22  ;;  %v840_v22 = vld [vmem:[%s4821_s22 + $0x8] sm:$0xff] }
 0x757   : > { %v4453_v31 = vadd.f32 %v2017_v28, %v4323_v17  ;;  %v2261_v28 = vld [vmem:[%s4208_s9 + $0x108] sm:$0xff] }
 0x758   : > { %v4456_v32 = vadd.f32 %v2012_v29, %v4320_v16  ;;  %v3442_v29 = vpack.c.bf16 %v2261_v28, %v2260_v27  ;;  %v2275_v27 = vld [vmem:[%s4208_s9 + $0x178] sm:$0xff] }
 0x759   : > { %2032 = vadd.xlane.f32.xlu1 %v4453_v31 }
 0x75a   : > { %2030 = vadd.xlane.f32.xlu0 %v4456_v32  ;;  %3443 = vmatprep.subr.bf16.mxu0 %v3442_v29 }
 0x75b   : > { %3445 = vmatpush3.bf16.msra.mxu0 %v3442_v29 }
 0x777   : > { %v2029_v14 = vpop.xlane.xlu0 %2028 }
 0x778   : > { %v2035_v17 = vmul.f32 0.03125, %v2029_v14  ;;  %v2027_v16 = vpop.xlane.xlu1 %2026  ;;  %v2238_v14 = vld [vmem:[%s4208_s9 + $0x50] sm:$0xff] }
 0x779   : > { %v2034_v36 = vmul.f32 0.03125, %v2027_v16 }
 0x77a   : > { %v2039_v39 = vsub.f32 %v2021_v25, %v2035_v17  ;;  %v4520_v25 = vld [vmem:[%s4820_s2 + $0x8] sm:$0xff]  ;;  %v2239_v17 = vld [vmem:[%s4208_s9 + $0x58] sm:$0xff] }
 0x77b   : > { %v2038_v50 = vsub.f32 %v2020_v26, %v2034_v36  ;;  %v2138_v26 = vadd.s32 4294967295, %v846_v24  ;;  %v2136_v16 = vadd.s32 4294967295, %v4520_v25  ;;  %v3432_v36 = vpack.c.bf16 %v2239_v17, %v2238_v14 }
 0x77c   : > { %v4467_v40 = vmul.f32 %v4464_v35, %v2039_v39  ;;  %v2262_v39 = vld [vmem:[%s4208_s9 + $0x110] sm:$0xff] }
 0x77d   : > { %v4470_v18 = vmul.f32 %v4464_v35, %v2038_v50  ;;  %vm2142_vm7 = vcmp.ge.s32.totalorder %v2138_v26, 0  ;;  %vm2146_vm8 = vcmp.lt.s32.totalorder %v2138_v26, 16  ;;  %v2263_v50 = vld [vmem:[%s4208_s9 + $0x118] sm:$0xff]  ;;  %vm2140_vm9 = vcmp.ge.s32.totalorder %v2136_v16, 0  ;;  %v2274_v26 = vld [vmem:[%s4208_s9 + $0x170] sm:$0xff] }
 0x77e   : > { %v2047_v41 = vmul.f32 %v4467_v40, %v4467_v40  ;;  %v3446_v42 = vpack.c.bf16 %v2263_v50, %v2262_v39  ;;  %vm2144_vm10 = vcmp.lt.s32.totalorder %v2136_v16, 16  ;;  %vm4544_vm11 = vmand %vm2142_vm7, %vm2146_vm8 }
 0x77f   : > { %v2046_v11 = vmul.f32 %v4470_v18, %v4470_v18  ;;  %vm2148_vm14 = vmand %vm2140_vm9, %vm2144_vm10  ;;  %v2154_v62 = vsel %vm4544_vm11, 1, %v3894_v33 }
 0x780   : > { %2052 = vadd.xlane.f32.xlu1 %v2047_v41  ;;  %v2151_v41 = vsel %vm2147_vm6, 1, %v3894_v33  ;;  %3447 = vmatprep.subr.bf16.mxu0 %v3446_v42  ;;  %v2152_v3 = vsel %vm2148_vm14, 1, %v3894_v33 }
 0x781   : > { %2050 = vadd.xlane.f32.xlu0 %v2046_v11  ;;  %v2191_v11 = vadd.s32 1, %v846_v24  ;;  %3449 = vmatpush3.bf16.msra.mxu0 %v3446_v42  ;;  %v2204_v24 = vsel %vm2200_vm5, 1, %v3894_v33 }
 0x782   : > { %3451 = vmatprep.subr.bf16.mxu0 %v3450_v56 }
 0x783   : > { %vm2195_vm12 = vcmp.ge.s32.totalorder %v2191_v11, 0  ;;  %vm2199_vm13 = vcmp.lt.s32.totalorder %v2191_v11, 16 }
 0x784   : > { %vm2203_vm15 = vmand %vm2195_vm12, %vm2199_vm13  ;;  %vm2122_vm12 = vcmask 1040384  }
 0x785   : > { %3453 = vmatpush3.bf16.msra.mxu0 %v3450_v56  ;;  %v2207_v5 = vsel %vm2203_vm15, 1, %v3894_v33  ;;  %vm2175_vm15 = vcmask 1046528  }
 0x786   : > { %3455 = vmatprep.subr.bf16.mxu0 %v3454_v4 }
 0x789   : > { %3457 = vmatpush3.bf16.msra.mxu0 %v3454_v4 }
 0x7e6   : > { %v2033_v9 = vpop.xlane.xlu1 %2032 }
 0x7e7   : > { %v2037_v46 = vmul.f32 0.03125, %v2033_v9  ;;  %v2031_v48 = vpop.xlane.xlu0 %2030  ;;  %v842_v9 = vld [vmem:[%s4822_s29 + $0x18] sm:$0xff] }
 0x7e8   : > { %v2036_v49 = vmul.f32 0.03125, %v2031_v48  ;;  %v2189_v48 = vadd.s32 1, %v4520_v25  ;;  %v3466_v25 = vpack.c.bf16 %v2273_v23, %v2272_v21 }
 0x7e9   : > { %v2041_v10 = vsub.f32 %v4453_v31, %v2037_v46  ;;  %v2254_v31 = vld [vmem:[%s4208_s9 + $0xd0] sm:$0xff]  ;;  %v3458_v46 = vpack.c.bf16 %v2269_v8, %v2268_v7 }
 0x7ea   : > { %v2040_v12 = vsub.f32 %v4456_v32, %v2036_v49  ;;  %v2255_v32 = vld [vmem:[%s4208_s9 + $0xd8] sm:$0xff]  ;;  %v2270_v49 = vld [vmem:[%s4208_s9 + $0x150] sm:$0xff]  ;;  %vm2193_vm6 = vcmp.ge.s32.totalorder %v2189_v48, 0  ;;  %vm2197_vm7 = vcmp.lt.s32.totalorder %v2189_v48, 16 }
 0x7eb   : > { %v4499_v13 = vmul.f32 %v4464_v35, %v2041_v10  ;;  %v3430_v30 = vpack.c.bf16 %v2255_v32, %v2254_v31  ;;  %3459 = vmatprep.subr.bf16.mxu0 %v3458_v46  ;;  %v2271_v10 = vld [vmem:[%s4208_s9 + $0x158] sm:$0xff]  ;;  %vm2201_vm8 = vmand %vm2193_vm6, %vm2197_vm7  ;;  %v2457_v31 = vld [vmem:[%s4210_s20] sm:$0xff] }
 0x7ec   : > { %v4502_v15 = vmul.f32 %v4464_v35, %v2040_v12  ;;  %v2153_v12 = vsel %vm2149_vm2, 1, %v3894_v33  ;;  %3461 = vmatpush3.bf16.msra.mxu0 %v3458_v46  ;;  %v2205_v28 = vsel %vm2201_vm8, 1, %v3894_v33  ;;  %v2458_v32 = vld [vmem:[%s4210_s20 + $0x8] sm:$0xff] }
 0x7ed   : > { %v2049_v19 = vmul.f32 %v4499_v13, %v4499_v13  ;;  %3431 = vmatprep.subr.bf16.mxu1 %v3430_v30  ;;  %v3474_v30 = vpack.c.bf16 %v2458_v32, %v2457_v31 }
 0x7ee   : > { %v2048_v20 = vmul.f32 %v4502_v15, %v4502_v15  ;;  %3433 = vmatpush3.bf16.msra.mxu1 %v3432_v36 }
 0x7ef   : > { %2056 = vadd.xlane.f32.xlu1 %v2049_v19  ;;  %3435 = vmatprep.subr.bf16.mxu1 %v3434_v34  ;;  %v3462_v19 = vpack.c.bf16 %v2271_v10, %v2270_v49  ;;  %v2949_v34 = vld [vmem:[%s806_s3] ss:$0 sm:$0xff] }
 0x7f0   : > { %2054 = vadd.xlane.f32.xlu0 %v2048_v20  ;;  %v2190_v20 = vadd.s32 1, %v845_v53 }
 0x7f1   : > { %3463 = vmatprep.subr.bf16.mxu0 %v3462_v19 }
 0x7f2   : > { %3437 = vmatpush3.bf16.msra.mxu1 %v3436_v52  ;;  %3465 = vmatpush3.bf16.msra.mxu0 %v3462_v19  ;;  %vm2194_vm9 = vcmp.ge.s32.totalorder %v2190_v20, 0  ;;  %vm2198_vm10 = vcmp.lt.s32.totalorder %v2190_v20, 16 }
 0x7f3   : > { %3439 = vmatprep.subr.bf16.mxu1 %v3438_v59  ;;  %3467 = vmatprep.subr.bf16.mxu0 %v3466_v25  ;;  %vm2202_vm11 = vmand %vm2194_vm9, %vm2198_vm10  ;;  %v2460_v59 = vld [vmem:[%s4210_s20 + $0x18] sm:$0xff] }
 0x7f4   : > { %v2206_v29 = vsel %vm2202_vm11, 1, %v3894_v33  ;;  %v3478_v63 = vpack.c.bf16 %v2460_v59, %v2459_v58 }
 0x7f6   : > { %3441 = vmatpush3.bf16.msra.mxu1 %v3440_v0  ;;  %3469 = vmatpush3.bf16.msra.mxu0 %v3466_v25 }
 0x7f7   : > { %3475 = vmatprep.subr.bf16.mxu1 %v3474_v30 }
 0x800   : > { %2101 = vperm.xlu1 %3626, %v840_v22   ;;  %v3470_v22 = vpack.c.bf16 %v2275_v27, %v2274_v26 }
 0x802   : > { %3471 = vmatprep.subr.bf16.mxu0 %v3470_v22 }
 0x803   : > { %3473 = vmatpush3.bf16.msra.mxu0 %v3470_v22 }
 0x804   : > { %2156 = vperm.xlu1 %3626, %v2151_v41  }
 0x806   : > { %2096 = vperm.xlu0 %3625, %v839_v51  }
 0x808   : > { %2106 = vperm.xlu1 %3626, %v841_v55  }
 0x80a   : > { %2165 = vperm.xlu0 %3625, %v2154_v62  }
 0x80c   : > { %2159 = vperm.xlu1 %3626, %v2152_v3  }
 0x80d   : > { %v2053_v17 = vpop.xlane.xlu1 %2052 }
 0x80e   : > { %2218 = vperm.xlu0 %3625, %v2207_v5   ;;  %v2051_v14 = vpop.xlane.xlu0 %2050  ;;  %v2059_v36 = vmul.f32 0.03125, %v2053_v17 }
 0x80f   : > { %v2058_v16 = vmul.f32 0.03125, %v2051_v14 }
 0x810   : > { %2111 = vperm.xlu1 %3626, %v842_v9   ;;  %v2063_v50 = vadd.f32 1e-05, %v2059_v36  ;;  %v2462_v36 = vld [vmem:[%s4210_s20 + $0x28] sm:$0xff] }
 0x811   : > { %v2062_v39 = vadd.f32 1e-05, %v2058_v16  ;;  %v2461_v16 = vld [vmem:[%s4210_s20 + $0x20] sm:$0xff] }
 0x813   : > { %3659 = vrsqrt.f32 %v2062_v39  ;;  %v3482_v39 = vpack.c.bf16 %v2462_v36, %v2461_v16 }
 0x814   : > { %2162 = vperm.xlu1 %3626, %v2153_v12   ;;  %3661 = vrsqrt.f32 %v2063_v50  ;;  %v2463_v50 = vld [vmem:[%s4210_s20 + $0x30] sm:$0xff] }
 0x818   : > { %2209 = vperm.xlu1 %3626, %v2204_v24  }
 0x81c   : > { %2212 = vperm.xlu1 %3626, %v2205_v28  }
 0x81d   : > { %v3660_v41 = vpop.eup %3659 }
 0x81e   : > { %v3662_v11 = vpop.eup %3661  ;;  %v2070_v33 = vmul.f32 %v3660_v41, %v4470_v18  ;;  %v2950_v18 = vld [vmem:[%s809_s12] ss:$0 sm:$0xff]  ;;  %v2464_v41 = vld [vmem:[%s4210_s20 + $0x38] sm:$0xff] }
 0x81f   : > { %v2071_v47 = vmul.f32 %v3662_v11, %v4467_v40  ;;  %v3486_v11 = vpack.c.bf16 %v2464_v41, %v2463_v50 }
 0x820   : > { %2215 = vperm.xlu1 %3626, %v2206_v29   ;;  %v2080_v53 = vmul.f32 %v2949_v34, %v2070_v33  ;;  %v2466_v33 = vld [vmem:[%s4210_s20 + $0x48] sm:$0xff] }
 0x821   : > { %v2081_v54 = vmul.f32 %v2949_v34, %v2071_v47  ;;  %v2469_v47 = vld [vmem:[%s4210_s20 + $0x60] sm:$0xff] }
 0x822   : > { %v2090_v55 = vadd.f32 %v2950_v18, %v2080_v53  ;;  %v2471_v53 = vld [vmem:[%s4210_s20 + $0x70] sm:$0xff] }
 0x823   : > { %v2091_v57 = vadd.f32 %v2950_v18, %v2081_v54 }
 0x87c   : > { %v2057_v42 = vpop.xlane.xlu1 %2056 }
 0x87d   : > { %v2061_v43 = vmul.f32 0.03125, %v2057_v42  ;;  %v2055_v44 = vpop.xlane.xlu0 %2054  ;;  %v2465_v42 = vld [vmem:[%s4210_s20 + $0x40] sm:$0xff] }
 0x87e   : > { %v2060_v45 = vmul.f32 0.03125, %v2055_v44  ;;  %v2467_v44 = vld [vmem:[%s4210_s20 + $0x50] sm:$0xff] }
 0x87f   : > { %v2065_v51 = vadd.f32 1e-05, %v2061_v43  ;;  %v3490_v43 = vpack.c.bf16 %v2466_v33, %v2465_v42 }
 0x880   : > { %v2064_v37 = vadd.f32 1e-05, %v2060_v45  ;;  %v4597_v52 = vpop.permute.xlu1 %2101 }
 0x881   : > { %3663 = vrsqrt.f32 %v2065_v51  ;;  %v4612_v60 = vmul.f32 %v4597_v52, %v2091_v57  ;;  %v2470_v51 = vld [vmem:[%s4210_s20 + $0x68] sm:$0xff] }
 0x882   : > { %3665 = vrsqrt.f32 %v2064_v37  ;;  %v3498_v37 = vpack.c.bf16 %v2470_v51, %v2469_v47 }
 0x883   : > { %v2124_v4 = vrot.slane %v4612_v60, 7  ;;  %v2177_v21 = vrot.slane %v4612_v60, 1 }
 0x884   : > { %v2157_v38 = vpop.permute.xlu1 %2156 }
 0x885   : > { %v4604_v56 = vpop.permute.xlu0 %2096  ;;  %vm2167_vm13 = vcmp.eq.s32.totalorder %v2157_v38, 1 }
 0x886   : > { %v4607_v40 = vmul.f32 %v4604_v56, %v2090_v55 }
 0x888   : > { %2347 = vmatprep.mubr.f32.mxu1 %v4607_v40  ;;  %v4615_v61 = vpop.permute.xlu1 %2106  ;;  %v2123_v62 = vrot.slane %v4607_v40, 7  ;;  %v2176_v19 = vrot.slane %v4607_v40, 1 }
 0x889   : > { %v2166_v26 = vpop.permute.xlu0 %2165 }
 0x88a   : > { %v2134_v0 = vsel %vm2122_vm12, 0.0, %v2123_v62  ;;  %v2125_v7 = vsel %vm2122_vm12, %v2123_v62, %v2124_v4  ;;  %v2178_v27 = vsel %vm2175_vm15, %v2176_v19, %v2177_v21  ;;  %vm2170_vm2 = vcmp.eq.s32.totalorder %v2166_v26, 1 }
 0x88b   : > { %v3664_v1 = vpop.eup %3663  ;;  %2952 = vmatmul.mubr.msk.f32.vlgmr.msra.gmra.mrb[10].mxu1 %vm2167_vm13, %v2134_v0 }
 0x88c   : > { %v3666_v2 = vpop.eup %3665  ;;  %2352 = vmatprep.mubr.f32.mxu1 %v4612_v60  ;;  %v2160_v3 = vpop.permute.xlu1 %2159  ;;  %v2073_v5 = vmul.f32 %v3664_v1, %v4499_v13  ;;  %3477 = vmatpush3.bf16.msra.mxu1 %v3474_v30 }
 0x88d   : > { %v2072_v6 = vmul.f32 %v3666_v2, %v4502_v15  ;;  %vm2168_vm14 = vcmp.eq.s32.totalorder %v2160_v3, 1  ;;  %3479 = vmatprep.subr.bf16.mxu1 %v3478_v63  ;;  %v2219_v32 = vpop.permute.xlu0 %2218  ;;  %v2951_v2 = vld [vmem:[%s812_s6] ss:$0 sm:$0xff] }
 0x88e   : > { %v2083_v8 = vmul.f32 %v2949_v34, %v2073_v5  ;;  %vm2223_vm5 = vcmp.eq.s32.totalorder %v2219_v32, 1 }
 0x88f   : > { %v2082_v9 = vmul.f32 %v2949_v34, %v2072_v6  ;;  %2953 = vmatmul.mubr.msk.f32.gmra.mrb[12].mxu1 %vm2168_vm14, %v2125_v7  ;;  %v2468_v34 = vld [vmem:[%s4210_s20 + $0x58] sm:$0xff] }
 0x890   : > { %v2093_v46 = vadd.f32 %v2950_v18, %v2083_v8  ;;  %v4624_v48 = vpop.permute.xlu1 %2111  ;;  %3481 = vmatpush3.bf16.msra.mxu1 %v3478_v63  ;;  %v3494_v45 = vpack.c.bf16 %v2468_v34, %v2467_v44 }
 0x891   : > { %v2092_v49 = vadd.f32 %v2950_v18, %v2082_v9  ;;  %3483 = vmatprep.subr.bf16.mxu1 %v3482_v39  ;;  %v2472_v18 = vld [vmem:[%s4210_s20 + $0x78] sm:$0xff] }
 0x892   : > { %v4630_v13 = vmul.f32 %v4624_v48, %v2093_v46  ;;  %v3502_v54 = vpack.c.bf16 %v2472_v18, %v2471_v53 }
 0x893   : > { %v4627_v10 = vmul.f32 %v4615_v61, %v2092_v49 }
 0x894   : > { %v2163_v12 = vpop.permute.xlu1 %2162  ;;  %v2128_v23 = vrot.slane %v4630_v13, 7  ;;  %v2181_v31 = vrot.slane %v4630_v13, 1  ;;  %3485 = vmatpush3.bf16.msra.mxu1 %v3482_v39 }
 0x895   : > { %2357 = vmatprep.mubr.f32.mxu1 %v4627_v10  ;;  %v2126_v15 = vrot.slane %v4627_v10, 7  ;;  %vm2169_vm0 = vcmp.eq.s32.totalorder %v2163_v12, 1  ;;  %v2179_v25 = vrot.slane %v4627_v10, 1  ;;  %3487 = vmatprep.subr.bf16.mxu1 %v3486_v11 }
 0x896   : > { %v2187_v17 = vsel %vm2175_vm15, %v2181_v31, 0.0 }
 0x897   : > { %v2127_v20 = vsel %vm2122_vm12, %v2124_v4, %v2126_v15  ;;  %v2129_v28 = vsel %vm2122_vm12, %v2126_v15, %v2128_v23  ;;  %v2180_v29 = vsel %vm2175_vm15, %v2177_v21, %v2179_v25  ;;  %v2182_v14 = vsel %vm2175_vm15, %v2179_v25, %v2181_v31 }
 0x898   : > { %2954 = vmatmul.mubr.msk.f32.gmra.mrb[14].mxu1 %vm2169_vm0, %v2127_v20  ;;  %v2210_v24 = vpop.permute.xlu1 %2209 }
 0x899   : > { %vm2220_vm1 = vcmp.eq.s32.totalorder %v2210_v24, 1  ;;  %2362 = vmatprep.mubr.f32.mxu1 %v4630_v13  ;;  %3489 = vmatpush3.bf16.msra.mxu1 %v3486_v11 }
 0x89a   : > { %3254 = vmatprep.mubr.msk.f32.mxu0 %vm2220_vm1, %v2178_v27  ;;  %3491 = vmatprep.subr.bf16.mxu1 %v3490_v43 }
 0x89c   : > { %2955 = vmatmul.mubr.msk.f32.gmra.mrb[16].mxu1 %vm2170_vm2, %v2129_v28  ;;  %v2213_v22 = vpop.permute.xlu1 %2212  ;;  %v2960_v28 = vld [vmem:[%s815_s1] ss:$0 sm:$0xff] }
 0x89d   : > { %vm2221_vm3 = vcmp.eq.s32.totalorder %v2213_v22, 1  ;;  %3493 = vmatpush3.bf16.msra.mxu1 %v3490_v43 }
 0x89e   : > { %3255 = vmatmul.mubr.msk.f32.vlgmr.msra.gmra.mrb[22].mxu0 %vm2221_vm3, %v2180_v29  ;;  %3495 = vmatprep.subr.bf16.mxu1 %v3494_v45 }
 0x8a0   : > { %v2216_v30 = vpop.permute.xlu1 %2215 }
 0x8a1   : > { %vm2222_vm4 = vcmp.eq.s32.totalorder %v2216_v30, 1  ;;  %3497 = vmatpush3.bf16.msra.mxu1 %v3494_v45 }
 0x8a2   : > { %3257 = vmatprep.mubr.msk.f32.mxu0 %vm2222_vm4, %v2182_v14  ;;  %3499 = vmatprep.subr.bf16.mxu1 %v3498_v37 }
 0x8a3   : > { %3258 = vmatmul.mubr.msk.f32.gmra.mrb[24].mxu0 %vm2223_vm5, %v2187_v17 }
 0x8a5   : > { %3501 = vmatpush3.bf16.msra.mxu1 %v3498_v37 }
 0x8a6   : > { %3503 = vmatprep.subr.bf16.mxu1 %v3502_v54 }
 0x8a9   : > { %3505 = vmatpush3.bf16.msra.mxu1 %v3502_v54 }
 0x95e   : > { %v3062_v38 = vpop.f32.mrb[10].mxu1 }
 0x95f   : > { %v3063_v55 = vpop.f32.mrb[11].mxu1 }
 0x960   : > { %v3064_v57 = vadd.f32 %v3063_v55, %v3062_v38 }
 0x962   : > { %v3065_v58 = vpop.f32.mrb[12].mxu1  ;;  %v2350_v8 = vadd.f32 %v3064_v57, %v2951_v2 }
 0x963   : > { %v3066_v59 = vpop.f32.mrb[13].mxu1 }
 0x964   : > { %v3067_v62 = vadd.f32 %v3066_v59, %v3065_v58 }
 0x966   : > { %v2355_v5 = vadd.f32 %v3067_v62, %v2951_v2 }
 0x96b   : > { %v3068_v63 = vpop.f32.mrb[14].mxu1 }
 0x96c   : > { %v3069_v0 = vpop.f32.mrb[15].mxu1 }
 0x96d   : > { %v3070_v1 = vadd.f32 %v3069_v0, %v3068_v63 }
 0x96f   : > { %v3071_v3 = vpop.f32.mrb[16].mxu1  ;;  %v2360_v21 = vadd.f32 %v3070_v1, %v2951_v2 }
 0x970   : > { %v3072_v4 = vpop.f32.mrb[17].mxu1 }
 0x971   : > { %v3073_v6 = vadd.f32 %v3072_v4, %v3071_v3  ;;  %v3256_v7 = vpop.f32.mrb[22].mxu0 }
 0x972   : > { %v2440_v9 = vadd.f32 %v3256_v7, %v2355_v5  ;;  %v2434_v46 = vpop.f32.mrb[23].mxu0 }
 0x973   : > { %v2435_v49 = vadd.f32 %v2434_v46, %v2350_v8  ;;  %v2365_v15 = vadd.f32 %v3073_v6, %v2951_v2  ;;  %v2961_v8 = vld [vmem:[%s818_s4] ss:$0 sm:$0xff] }
 0x974   : > { %v2454_v19 = vmax.f32 %v2440_v9, 0.0 }
 0x975   : > { %v2453_v12 = vmax.f32 %v2435_v49, 0.0  ;;  %v2962_v49 = vld [vmem:[%s821_s13] ss:$0 sm:$0xff] }
 0x976   : > { %v3259_v20 = vpop.f32.mrb[24].mxu0 }
 0x977   : > { %v2450_v23 = vadd.f32 %v3259_v20, %v2365_v15  ;;  %v2444_v24 = vpop.f32.mrb[25].mxu0  ;;  %3292 = vmatprep.mubr.f32.mxu1 %v2453_v12 }
 0x978   : > { %v2445_v25 = vadd.f32 %v2444_v24, %v2360_v21  ;;  %3293 = vmatmul.mubr.f32.vlgmr.msra.gmra.mrb[18].mxu1 %v2454_v19 }
 0x979   : > { %v2456_v27 = vmax.f32 %v2450_v23, 0.0 }
 0x97a   : > { %v2455_v26 = vmax.f32 %v2445_v25, 0.0 }
 0x97c   : > { %3295 = vmatprep.mubr.f32.mxu1 %v2455_v26 }
 0x97d   : > { %3296 = vmatmul.mubr.f32.gmra.mrb[20].mxu1 %v2456_v27 }
 0xa4b   : > { %v3294_v22 = vpop.f32.mrb[18].mxu1 }
 0xa4c   : > { %v2552_v29 = vadd.f32 %v3294_v22, %v2960_v28  ;;  %v2546_v31 = vpop.f32.mrb[19].mxu1 }
 0xa4d   : > { %v2547_v32 = vadd.f32 %v2960_v28, %v2546_v31 }
 0xa4e   : > { %v2566_v30 = vadd.f32 %v2552_v29, %v4612_v60 }
 0xa4f   : > { %v2565_v14 = vadd.f32 %v2547_v32, %v4607_v40 }
 0xa50   : > { %2573 = vadd.xlane.f32.xlu0 %v2566_v30  ;;  %v3297_v17 = vpop.f32.mrb[20].mxu1 }
 0xa51   : > { %v2562_v16 = vadd.f32 %v3297_v17, %v2960_v28  ;;  %2571 = vadd.xlane.f32.xlu1 %v2565_v14  ;;  %v2556_v36 = vpop.f32.mrb[21].mxu1 }
 0xa52   : > { %v2557_v39 = vadd.f32 %v2960_v28, %v2556_v36 }
 0xa53   : > { %v2568_v50 = vadd.f32 %v2562_v16, %v4630_v13 }
 0xa54   : > { %v2567_v41 = vadd.f32 %v2557_v39, %v4627_v10 }
 0xa55   : > { %2577 = vadd.xlane.f32.xlu1 %v2568_v50 }
 0xa56   : > { %2575 = vadd.xlane.f32.xlu0 %v2567_v41 }
 0xadd   : > { %v2574_v11 = vpop.xlane.xlu0 %2573 }
 0xade   : > { %v2580_v42 = vmul.f32 0.03125, %v2574_v11  ;;  %v2572_v33 = vpop.xlane.xlu1 %2571 }
 0xadf   : > { %v2579_v43 = vmul.f32 0.03125, %v2572_v33 }
 0xae0   : > { %v2584_v44 = vsub.f32 %v2566_v30, %v2580_v42 }
 0xae1   : > { %v2583_v60 = vsub.f32 %v2565_v14, %v2579_v43 }
 0xae2   : > { %v2578_v34 = vpop.xlane.xlu1 %2577  ;;  %v2588_v40 = vmul.f32 %v4464_v35, %v2584_v44 }
 0xae3   : > { %v2582_v45 = vmul.f32 0.03125, %v2578_v34  ;;  %v2576_v47 = vpop.xlane.xlu0 %2575  ;;  %v2587_v51 = vmul.f32 %v4464_v35, %v2583_v60 }
 0xae4   : > { %v2581_v37 = vmul.f32 0.03125, %v2576_v47  ;;  %v2592_v53 = vmul.f32 %v2588_v40, %v2588_v40 }
 0xae5   : > { %v2586_v13 = vsub.f32 %v2568_v50, %v2582_v45  ;;  %v2591_v18 = vmul.f32 %v2587_v51, %v2587_v51 }
 0xae6   : > { %v2585_v10 = vsub.f32 %v2567_v41, %v2581_v37  ;;  %2597 = vadd.xlane.f32.xlu1 %v2592_v53 }
 0xae7   : > { %2595 = vadd.xlane.f32.xlu0 %v2591_v18  ;;  %v2590_v54 = vmul.f32 %v4464_v35, %v2586_v13 }
 0xae8   : > { %v2589_v38 = vmul.f32 %v4464_v35, %v2585_v10 }
 0xae9   : > { %v2594_v55 = vmul.f32 %v2590_v54, %v2590_v54 }
 0xaea   : > { %v2593_v57 = vmul.f32 %v2589_v38, %v2589_v38 }
 0xaeb   : > { %2601 = vadd.xlane.f32.xlu1 %v2594_v55 }
 0xaec   : > { %2599 = vadd.xlane.f32.xlu0 %v2593_v57 }
 0xb73   : > { %v2598_v58 = vpop.xlane.xlu1 %2597 }
 0xb74   : > { %v2604_v59 = vmul.f32 0.03125, %v2598_v58  ;;  %v2596_v62 = vpop.xlane.xlu0 %2595 }
 0xb75   : > { %v2603_v63 = vmul.f32 0.03125, %v2596_v62 }
 0xb76   : > { %v2608_v0 = vadd.f32 1e-05, %v2604_v59 }
 0xb77   : > { %v2607_v1 = vadd.f32 1e-05, %v2603_v63 }
 0xb78   : > { %3667 = vrsqrt.f32 %v2608_v0  ;;  %v2602_v2 = vpop.xlane.xlu1 %2601 }
 0xb79   : > { %3669 = vrsqrt.f32 %v2607_v1  ;;  %v2606_v3 = vmul.f32 0.03125, %v2602_v2  ;;  %v2600_v4 = vpop.xlane.xlu0 %2599 }
 0xb7a   : > { %v2605_v5 = vmul.f32 0.03125, %v2600_v4 }
 0xb7b   : > { %v2610_v6 = vadd.f32 1e-05, %v2606_v3 }
 0xb7c   : > { %v2609_v35 = vadd.f32 1e-05, %v2605_v5 }
 0xb7d   : > { %3671 = vrsqrt.f32 %v2610_v6 }
 0xb7e   : > { %3673 = vrsqrt.f32 %v2609_v35 }
 0xb82   : > { %v3668_v7 = vpop.eup %3667 }
 0xb83   : > { %v3670_v9 = vpop.eup %3669  ;;  %v2616_v46 = vmul.f32 %v3668_v7, %v2588_v40 }
 0xb84   : > { %v2615_v12 = vmul.f32 %v3670_v9, %v2587_v51 }
 0xb85   : > { %v2626_v15 = vmul.f32 %v2961_v8, %v2616_v46 }
 0xb86   : > { %v2625_v19 = vmul.f32 %v2961_v8, %v2615_v12 }
 0xb87   : > { %v3672_v20 = vpop.eup %3671  ;;  %v2636_v21 = vadd.f32 %v2962_v49, %v2626_v15 }
 0xb88   : > { %v3674_v23 = vpop.eup %3673  ;;  %v2635_v24 = vadd.f32 %v2962_v49, %v2625_v19  ;;  %v2618_v25 = vmul.f32 %v3672_v20, %v2590_v54 }
 0xb89   : > { %v2640_v26 = vmul.f32 %v2636_v21, %v4597_v52  ;;  %v2617_v27 = vmul.f32 %v3674_v23, %v2589_v38 }
 0xb8a   : > { %v2639_v28 = vmul.f32 %v2635_v24, %v4604_v56  ;;  %v2628_v22 = vmul.f32 %v2961_v8, %v2618_v25 }
 0xb8b   : > { %2644 = vst [vmem:[#allocation2 + $0x8] sm:$0xff] %v2640_v26  ;;  %v2627_v29 = vmul.f32 %v2961_v8, %v2617_v27  ;;  %2650 = sbr.rel (%p2963_p4) target bundleno = 2962 (0xb92), region = 108  ;;  %2652 = vst [vmem:[#allocation11 + $0x8] sm:$0xff] (!%p2963_p4), %v2640_v26 }
 0xb8c   : > { %2643 = vst [vmem:[#allocation2] sm:$0xff] %v2639_v28  ;;  %v2638_v31 = vadd.f32 %v2962_v49, %v2628_v22  ;;  %2651 = vst [vmem:[#allocation11] sm:$0xff] (!%p2963_p4), %v2639_v28 }
 0xb8d   : > { %v2637_v32 = vadd.f32 %v2962_v49, %v2627_v29 }
 0xb8e   : > { %v2642_v30 = vmul.f32 %v2638_v31, %v4624_v48 }
 0xb8f   : > { %v2641_v14 = vmul.f32 %v2637_v32, %v4615_v61 }
 0xb90   : > { %2646 = vst [vmem:[#allocation2 + $0x18] sm:$0xff] %v2642_v30  ;;  %2654 = vst [vmem:[#allocation11 + $0x18] sm:$0xff] (!%p2963_p4), %v2642_v30 }
 0xb91   : > { %2645 = vst [vmem:[#allocation2 + $0x10] sm:$0xff] %v2641_v14  ;;  %2653 = vst [vmem:[#allocation11 + $0x10] sm:$0xff] (!%p2963_p4), %v2641_v14 }
 0xb92 PF: > { %p3543_p2 = scmp.eq.s32.totalorder %s4078_s27, 1  ;;  %s3895_s28 = smov [#allocation11]  }
 0xb93   : > { %s2664_s4 = sshll.u32 %s3895_s28, 4  ;;  %s2665_s4 = int_to_ptr.vmem [resolvable:$true] %s2664_s4 }
 0xb94   : > { %s3793_s13 = scalar_lea.vmem %s2665_s4, 512  ;;  %p3800_p9 = scmp.lt.s32.totalorder %s2665_s4, %s2665_s4 }
 0xb95   : > { %p3794_p8 = scmp.ne.s32.totalorder %s2665_s4, %s3793_s13  ;;  %p3801_p12 = scmp.lt.s32.totalorder %s3793_s13, %s3793_s13 }
 0xb97   : > { %p3795_p3 = pnand %p3794_p8, %p3543_p2  ;;  %p3802_p10 = por %p3801_p12, %p3800_p9 }
 0xb99   : > { %p3796_p7 = pneg %p3795_p3 }
 0xb9b   : > { %p3803_p6 = pnand %p3802_p10, %p3796_p7 }
 0xb9d   : > { %3806 = shalt.err (!%p3803_p6)
}
 0xb9e   : > { %s4830_s18 = sld [smem:[#allocation36_spill]] }
 0xba4   : > { %s3807_s15 = scalar_lea.hbm %s4830_s18, 512 }
 0xba5   : > { %p3808_p11 = scmp.ne.s32.totalorder %s4830_s18, %s3807_s15  ;;  %p3813_p13 = scmp.lt.u32.totalorder %s3807_s15, %s4830_s18 }
 0xba7   : > { %p3809_p5 = pnand %p3808_p11, %p3543_p2 }
 0xba9   : > { %p3810_p0 = pneg %p3809_p5 }
 0xbab   : > { %p3815_p1 = pnand %p3813_p13, %p3810_p0 }
 0xbad   : > { %3818 = shalt.err (!%p3815_p1)
}
 0xbae   : > { %s3896_s16 = smov 128   ;;  %s3897_s5 = smov 8  }
 0xbaf   : > { %3523 = dma.vmem_to_hbm [thread:$0]  (%p3543_p2), %s2665_s4, 512, %s4830_s18, [#allocation5], %s3896_s16, %s3896_s16, %s3897_s5  }
 0xbb0   : > { %3856 = dma.done.wait (%p3543_p2), [#allocation5], 512  }
 0xbb1   : > { %3858 = vsyncadd (%p3543_p2), [#allocation5], 4294966784 }
 0xbb2 PF: > { %s4831_s10 = sld [smem:[#allocation19_spill]]  ;;  %s4832_s21 = sld [smem:[#allocation16_spill]] }
 0xbb3   : > { %s4833_s22 = sld [smem:[#allocation17_spill]]  ;;  %s4834_s23 = sld [smem:[#allocation21_spill]] }
 0xbb4   : > { %s4835_s24 = sld [smem:[#allocation18_spill]]  ;;  %s4836_s25 = sld [smem:[#allocation20_spill]] }
 0xbb8   : > { %s34_s26 = sadd.s32 1, %s4831_s10  }
 0xbb9   : > { %p31_p4 = scmp.ge.s32.totalorder %s34_s26, 4  }
 0xbbb   :  { %33 = sbr.rel (!%p31_p4) target bundleno = 24 (0x18), region = 194 }
 0xbc2   :  { %2680 = vsyncpa [#allocation4], 1 }
 0xbc3   :  { %2682 = vsyncpa [#allocation4 + $0x1], 1 }
 0xbc4   :  { %2683 = vsyncpa [#allocation7], 1 }
 0xbc5   :  { %2685 = vsyncpa [#allocation7 + $0x1], 1 }
 0xbc6   :  { %2686 = vsyncpa [#allocation10], 1 }
 0xbc7   :  { %2688 = vsyncpa [#allocation10 + $0x1], 1 }
 0xbc8   :  { %2689 = vsyncpa [#allocation5], 1 }
 0xbc9   :  { %2691 = vsyncpa [#allocation5 + $0x1], 1 }

</bundles_post_ra>
